<compile_context>
chip_gen: v6e
topology: v6e:2x2x1
jax: 0.10.0
libtpu: 0.0.40
codegen_flags: <defaults>
</compile_context>

<pallas_src>
import functools

import jax
import jax.numpy as jnp
from jax import lax
from jax.experimental import pallas as pl
from jax.experimental.pallas import tpu as pltpu


# ------------------------------ fused kernel --------------------------------

def _fused_mainnet_kernel(s, x, y, NC, S,
                          de_ref, deg_ref, wi_ref, wp_ref, wr_ref, out_ref):
    """Whole MainNet forward on one LR plane layout (x, Y), Y = y*NC.

    de_ref : SMEM f32[2*S]        (delta, eta) per stage
    deg_ref: VMEM f32[x, Y]       degLF, lane index = j*NC + n*C + c
    wi_ref : VMEM f32[K*K, Y]     recon_init weights, lane-tiled per channel
    wp_ref : VMEM f32[S, K*K, Y]  per-stage proj weights, lane-tiled
    wr_ref : VMEM f32[S, K*K, Y]  per-stage recon weights, lane-tiled
    out_ref: VMEM f32[s*s, x, Y]  HR result in phase layout, phase = r*s + t
    """
    K = 2 * s
    p = s // 2
    Y = y * NC

    lane = lax.broadcasted_iota(jnp.int32, (x, Y), 1)
    mlane_hi = lane < (Y - NC)      # valid lanes when reading column j+1
    mlane_lo = lane >= NC           # valid lanes when reading column j-1
    zrow = jnp.zeros((1, Y), jnp.float32)

    def shifted(v, a, b):
        """w[i, j*NC+nc] = v[i+a, (j+b)*NC+nc], zero outside; a,b in {-1,0,1}."""
        out = v
        if a == 1:
            out = jnp.concatenate([out[1:, :], zrow], axis=0)
        elif a == -1:
            out = jnp.concatenate([zrow, out[:x - 1, :]], axis=0)
        if b != 0:
            out = pltpu.roll(out, shift=(-b * NC) % Y, axis=1)
            out = jnp.where(mlane_hi if b == 1 else mlane_lo, out, 0.0)
        return out

    def ab_set(r):
        # offsets a such that the tap index a*s + r + p lies in [0, 2s)
        return (0, 1) if (r + p) < s else (-1, 0)

    def transposed_conv(src, w2d):
        """Depthwise ConvTranspose2d(k=2s, stride=s, pad=s//2) of LR `src`.

        Returns s*s HR phase planes (each (x, Y)); phase (r, t) holds
        HR[i*s + r, j*s + t]."""
        phases = []
        for r in range(s):
            for t in range(s):
                acc = jnp.zeros((x, Y), jnp.float32)
                for a in ab_set(r):
                    for b in ab_set(t):
                        k = (a * s + r + p) * K + (b * s + t + p)
                        acc = acc + w2d[k:k + 1] * shifted(src, -a, -b)
                phases.append(acc)
        return phases

    deg = deg_ref[...]

    # initLF = recon_init(degLF)
    out_ph = transposed_conv(deg, wi_ref[...])

    for st in range(S):
        delta = de_ref[2 * st]
        # eta = de_ref[2 * st + 1]   # unused: RefNet stub makes err2 == 0
        wp = wp_ref[st]
        wr = wr_ref[st]

        # proj(out) - degLF : depthwise Conv2d(k=2s, stride=s, pad=s//2)
        pd = -deg
        for r in range(s):
            for t in range(s):
                ph = out_ph[r * s + t]
                for a in ab_set(r):
                    for b in ab_set(t):
                        k = (a * s + r + p) * K + (b * s + t + p)
                        pd = pd + wp[k:k + 1] * shifted(ph, a, b)

        # err1 = recon(proj(out) - deg); update fused as the stage epilogue.
        err_ph = transposed_conv(pd, wr)
        # TODO(synk): RefNet is not defined in the provided module source; it is
        # stubbed as identity, so err2 = out - refnet(out) == 0 and the eta term
        # contributes nothing (eta kept as a parameter, not used in compute).
        out_ph = [out_ph[k] - delta * err_ph[k] for k in range(s * s)]

    for k in range(s * s):
        out_ref[k] = out_ph[k]


# ------------------------------- op wrapper ----------------------------------

def _tile_weights(w_flat, C, K, N, y):
    """w_flat[c*K*K + k] -> (K*K, y*N*C) lane-tiled per-tap weight vectors."""
    KK = K * K
    w = w_flat.reshape(C, KK).T                               # (KK, C)
    w = jnp.broadcast_to(w[:, None, None, :], (KK, y, N, C))
    return w.reshape(KK, y * N * C)


def mainnet_forward(degLF, params, s):
    b, u, v, c, x, y = degLF.shape
    N = b * u * v
    NC = N * c
    Y = y * NC
    K = 2 * s
    S = len(params["stages"])

    # (N,C,x,y) -> (x, y*N*C); lane index = j*NC + n*C + ch (one-time, tiny)
    deg2d = degLF.reshape(N, c, x, y).transpose(2, 3, 0, 1).reshape(x, Y)

    wi = _tile_weights(params["recon_init_w"], c, K, N, y)
    wp = jnp.stack([_tile_weights(st["proj_w"], c, K, N, y)
                    for st in params["stages"]])
    wr = jnp.stack([_tile_weights(st["recon_w"], c, K, N, y)
                    for st in params["stages"]])
    de = jnp.concatenate([st["delta_eta"] for st in params["stages"]])

    kernel = functools.partial(_fused_mainnet_kernel, s, x, y, NC, S)
    out_ph = pl.pallas_call(
        kernel,
        out_shape=jax.ShapeDtypeStruct((s * s, x, Y), jnp.float32),
        grid=(1,),
        in_specs=[
            pl.BlockSpec(memory_space=pltpu.MemorySpace.SMEM),       # delta/eta
            pl.BlockSpec((x, Y), lambda i: (0, 0)),                  # degLF
            pl.BlockSpec((K * K, Y), lambda i: (0, 0)),              # recon_init w
            pl.BlockSpec((S, K * K, Y), lambda i: (0, 0, 0)),        # proj w
            pl.BlockSpec((S, K * K, Y), lambda i: (0, 0, 0)),        # recon w
        ],
        out_specs=pl.BlockSpec((s * s, x, Y), lambda i: (0, 0, 0)),
    )(de, deg2d, wi, wp, wr)

    # phase layout (r, t, i, j, n, ch) -> (b, u, v, c, hx, hy); one-time relayout
    hr = (out_ph.reshape(s, s, x, y, N, c)
                .transpose(4, 5, 2, 0, 3, 1)
                .reshape(N, c, x * s, y * s))
    return hr.reshape(b, u, v, c, x * s, y * s)


# -------------------------- pure-JAX reference (check) -----------------------

def _ref_proj(xhr, w, s):
    p = s // 2
    C = xhr.shape[1]
    return lax.conv_general_dilated(
        xhr, w, window_strides=(s, s), padding=[(p, p), (p, p)],
        dimension_numbers=("NCHW", "OIHW", "NCHW"), feature_group_count=C)


def _ref_recon(xlr, w, s):
    p = s // 2
    K = 2 * s
    C = xlr.shape[1]
    wf = w[:, :, ::-1, ::-1]
    return lax.conv_general_dilated(
        xlr, wf, window_strides=(1, 1),
        padding=[(K - 1 - p, K - 1 - p)] * 2, lhs_dilation=(s, s),
        dimension_numbers=("NCHW", "OIHW", "NCHW"), feature_group_count=C)


def mainnet_forward_ref(degLF, params, s):
    b, u, v, c, x, y = degLF.shape
    N = b * u * v
    K = 2 * s
    deg = degLF.reshape(N, c, x, y)
    out = _ref_recon(deg, params["recon_init_w"].reshape(c, 1, K, K), s)
    for st in params["stages"]:
        refnet_out = out                                    # RefNet stub: identity
        pd = _ref_proj(out, st["proj_w"].reshape(c, 1, K, K), s) - deg
        err1 = _ref_recon(pd, st["recon_w"].reshape(c, 1, K, K), s)
        delta, eta = st["delta_eta"][0], st["delta_eta"][1]
        out = out - delta * (err1 + eta * (out - refnet_out))
    return out.reshape(b, u, v, c, x * s, y * s)


# --------------------------------- params ------------------------------------

def init_params(key, C, s, stage_num):
    K = 2 * s
    bound = (6.0 / (2.0 * K * K)) ** 0.5      # xavier_uniform-style bound
    n_keys = 1 + 4 * stage_num
    keys = jax.random.split(key, n_keys)
    ki = iter(range(n_keys))
    params = {
        "recon_init_w": jax.random.uniform(
            keys[next(ki)], (C * K * K,), jnp.float32, -bound, bound),
        "stages": [],
    }
    for _ in range(stage_num):
        proj_w = jax.random.uniform(
            keys[next(ki)], (C * K * K,), jnp.float32, -bound, bound)
        recon_w = jax.random.uniform(
            keys[next(ki)], (C * K * K,), jnp.float32, -bound, bound)
        delta = jax.random.uniform(keys[next(ki)], (1,), jnp.float32)
        eta = jax.random.uniform(keys[next(ki)], (1,), jnp.float32)
        params["stages"].append({
            "proj_w": proj_w,
            "recon_w": recon_w,
            "delta_eta": jnp.concatenate([delta, eta]),
        })
    return params


# ----------------------------------- main -------------------------------------

if __name__ == "__main__":
    b, u, v, c = 1, 2, 2, 4          # angular views u x v, channelNum = c
    x = y = 8                        # LR spatial
    scale = 2                        # opt.scaleFactor
    stage_num = 2                    # opt.stageNum

    key = jax.random.PRNGKey(0)
    kp, kd = jax.random.split(key)
    params = init_params(kp, c, scale, stage_num)
    degLF = jax.random.normal(kd, (b, u, v, c, x, y), jnp.float32)

    fwd = jax.jit(functools.partial(mainnet_forward, s=scale))
    out = jax.block_until_ready(fwd(degLF, params))

    ref = mainnet_forward_ref(degLF, params, scale)
    assert out.shape == (b, u, v, c, x * scale, y * scale), out.shape
    max_err = float(jnp.max(jnp.abs(out - ref)))
    assert max_err < 1e-4, f"mismatch vs reference: {max_err}"

    print("KERNEL_OK")
</pallas_src>

<mosaic_0001>
module attributes {stable_mosaic.version = 11 : i64} {
  func.func @_fused_mainnet_kernel(%arg0: i32, %arg1: memref<4xf32, #tpu.memory_space<smem>>, %arg2: memref<8x128xf32, #tpu.memory_space<vmem>>, %arg3: memref<16x128xf32, #tpu.memory_space<vmem>>, %arg4: memref<2x16x128xf32, #tpu.memory_space<vmem>>, %arg5: memref<2x16x128xf32, #tpu.memory_space<vmem>>, %arg6: memref<4x8x128xf32, #tpu.memory_space<vmem>>) attributes {dimension_semantics = [#tpu.dimension_semantics<arbitrary>], iteration_bounds = array<i64: 1>, scalar_prefetch = 0 : i64, scratch_operands = 0 : i64, tpu.core_type = #tpu.core_type<tc>, window_params = [{transform_indices = @transform_0, window_bounds = array<i64: 4>}, {pipeline_mode = #tpu.pipeline_mode<synchronous>, transform_indices = @transform_1, window_bounds = array<i64: 8, 128>}, {pipeline_mode = #tpu.pipeline_mode<synchronous>, transform_indices = @transform_2, window_bounds = array<i64: 16, 128>}, {pipeline_mode = #tpu.pipeline_mode<synchronous>, transform_indices = @transform_3, window_bounds = array<i64: 2, 16, 128>}, {pipeline_mode = #tpu.pipeline_mode<synchronous>, transform_indices = @transform_4, window_bounds = array<i64: 2, 16, 128>}, {pipeline_mode = #tpu.pipeline_mode<synchronous>, transform_indices = @transform_5, window_bounds = array<i64: 4, 8, 128>}]} {
    %0 = tpu.iota {dimensions = array<i32: 1>} : vector<8x128xi32>
    %c112_i32 = arith.constant 112 : i32
    %1 = vector.broadcast %c112_i32 : i32 to vector<8x128xi32>
    %2 = arith.cmpi slt, %0, %1 : vector<8x128xi32>
    %c16_i32 = arith.constant 16 : i32
    %3 = vector.broadcast %c16_i32 : i32 to vector<8x128xi32>
    %4 = arith.cmpi sge, %0, %3 : vector<8x128xi32>
    %cst = arith.constant 0.000000e+00 : f32
    %5 = vector.broadcast %cst : f32 to vector<1x128xf32>
    %c0 = arith.constant 0 : index
    %c0_0 = arith.constant 0 : index
    %6 = vector.load %arg2[%c0, %c0_0] : memref<8x128xf32, #tpu.memory_space<vmem>>, vector<8x128xf32>
    %c0_1 = arith.constant 0 : index
    %c0_2 = arith.constant 0 : index
    %7 = vector.load %arg3[%c0_1, %c0_2] : memref<16x128xf32, #tpu.memory_space<vmem>>, vector<16x128xf32>
    %cst_3 = arith.constant 0.000000e+00 : f32
    %8 = vector.broadcast %cst_3 : f32 to vector<8x128xf32>
    %9 = vector.extract_strided_slice %7 {offsets = [5, 0], sizes = [1, 128], strides = [1, 1]} : vector<16x128xf32> to vector<1x128xf32>
    %10 = vector.broadcast %9 : vector<1x128xf32> to vector<8x128xf32>
    %11 = arith.mulf %10, %6 : vector<8x128xf32>
    %12 = arith.addf %8, %11 : vector<8x128xf32>
    %13 = vector.extract_strided_slice %7 {offsets = [7, 0], sizes = [1, 128], strides = [1, 1]} : vector<16x128xf32> to vector<1x128xf32>
    %c16_i32_4 = arith.constant 16 : i32
    %14 = tpu.dynamic_rotate %6 by %c16_i32_4 dim 1 : vector<8x128xf32>, i32 -> vector<8x128xf32>
    %cst_5 = arith.constant 0.000000e+00 : f32
    %15 = vector.broadcast %cst_5 : f32 to vector<8x128xf32>
    %16 = arith.select %4, %14, %15 : vector<8x128xi1>, vector<8x128xf32>
    %17 = vector.broadcast %13 : vector<1x128xf32> to vector<8x128xf32>
    %18 = arith.mulf %17, %16 : vector<8x128xf32>
    %19 = arith.addf %12, %18 : vector<8x128xf32>
    %20 = vector.extract_strided_slice %7 {offsets = [13, 0], sizes = [1, 128], strides = [1, 1]} : vector<16x128xf32> to vector<1x128xf32>
    %21 = vector.extract_strided_slice %6 {offsets = [0, 0], sizes = [7, 128], strides = [1, 1]} : vector<8x128xf32> to vector<7x128xf32>
    %22 = tpu.concatenate %5, %21 in 0 : vector<1x128xf32>, vector<7x128xf32> -> vector<8x128xf32>
    %23 = vector.broadcast %20 : vector<1x128xf32> to vector<8x128xf32>
    %24 = arith.mulf %23, %22 : vector<8x128xf32>
    %25 = arith.addf %19, %24 : vector<8x128xf32>
    %26 = vector.extract_strided_slice %7 {offsets = [15, 0], sizes = [1, 128], strides = [1, 1]} : vector<16x128xf32> to vector<1x128xf32>
    %27 = vector.extract_strided_slice %6 {offsets = [0, 0], sizes = [7, 128], strides = [1, 1]} : vector<8x128xf32> to vector<7x128xf32>
    %28 = tpu.concatenate %5, %27 in 0 : vector<1x128xf32>, vector<7x128xf32> -> vector<8x128xf32>
    %c16_i32_6 = arith.constant 16 : i32
    %29 = tpu.dynamic_rotate %28 by %c16_i32_6 dim 1 : vector<8x128xf32>, i32 -> vector<8x128xf32>
    %cst_7 = arith.constant 0.000000e+00 : f32
    %30 = vector.broadcast %cst_7 : f32 to vector<8x128xf32>
    %31 = arith.select %4, %29, %30 : vector<8x128xi1>, vector<8x128xf32>
    %32 = vector.broadcast %26 : vector<1x128xf32> to vector<8x128xf32>
    %33 = arith.mulf %32, %31 : vector<8x128xf32>
    %34 = arith.addf %25, %33 : vector<8x128xf32>
    %cst_8 = arith.constant 0.000000e+00 : f32
    %35 = vector.broadcast %cst_8 : f32 to vector<8x128xf32>
    %36 = vector.extract_strided_slice %7 {offsets = [4, 0], sizes = [1, 128], strides = [1, 1]} : vector<16x128xf32> to vector<1x128xf32>
    %c112_i32_9 = arith.constant 112 : i32
    %37 = tpu.dynamic_rotate %6 by %c112_i32_9 dim 1 : vector<8x128xf32>, i32 -> vector<8x128xf32>
    %cst_10 = arith.constant 0.000000e+00 : f32
    %38 = vector.broadcast %cst_10 : f32 to vector<8x128xf32>
    %39 = arith.select %2, %37, %38 : vector<8x128xi1>, vector<8x128xf32>
    %40 = vector.broadcast %36 : vector<1x128xf32> to vector<8x128xf32>
    %41 = arith.mulf %40, %39 : vector<8x128xf32>
    %42 = arith.addf %35, %41 : vector<8x128xf32>
    %43 = vector.extract_strided_slice %7 {offsets = [6, 0], sizes = [1, 128], strides = [1, 1]} : vector<16x128xf32> to vector<1x128xf32>
    %44 = vector.broadcast %43 : vector<1x128xf32> to vector<8x128xf32>
    %45 = arith.mulf %44, %6 : vector<8x128xf32>
    %46 = arith.addf %42, %45 : vector<8x128xf32>
    %47 = vector.extract_strided_slice %7 {offsets = [12, 0], sizes = [1, 128], strides = [1, 1]} : vector<16x128xf32> to vector<1x128xf32>
    %48 = vector.extract_strided_slice %6 {offsets = [0, 0], sizes = [7, 128], strides = [1, 1]} : vector<8x128xf32> to vector<7x128xf32>
    %49 = tpu.concatenate %5, %48 in 0 : vector<1x128xf32>, vector<7x128xf32> -> vector<8x128xf32>
    %c112_i32_11 = arith.constant 112 : i32
    %50 = tpu.dynamic_rotate %49 by %c112_i32_11 dim 1 : vector<8x128xf32>, i32 -> vector<8x128xf32>
    %cst_12 = arith.constant 0.000000e+00 : f32
    %51 = vector.broadcast %cst_12 : f32 to vector<8x128xf32>
    %52 = arith.select %2, %50, %51 : vector<8x128xi1>, vector<8x128xf32>
    %53 = vector.broadcast %47 : vector<1x128xf32> to vector<8x128xf32>
    %54 = arith.mulf %53, %52 : vector<8x128xf32>
    %55 = arith.addf %46, %54 : vector<8x128xf32>
    %56 = vector.extract_strided_slice %7 {offsets = [14, 0], sizes = [1, 128], strides = [1, 1]} : vector<16x128xf32> to vector<1x128xf32>
    %57 = vector.extract_strided_slice %6 {offsets = [0, 0], sizes = [7, 128], strides = [1, 1]} : vector<8x128xf32> to vector<7x128xf32>
    %58 = tpu.concatenate %5, %57 in 0 : vector<1x128xf32>, vector<7x128xf32> -> vector<8x128xf32>
    %59 = vector.broadcast %56 : vector<1x128xf32> to vector<8x128xf32>
    %60 = arith.mulf %59, %58 : vector<8x128xf32>
    %61 = arith.addf %55, %60 : vector<8x128xf32>
    %cst_13 = arith.constant 0.000000e+00 : f32
    %62 = vector.broadcast %cst_13 : f32 to vector<8x128xf32>
    %63 = vector.extract_strided_slice %7 {offsets = [1, 0], sizes = [1, 128], strides = [1, 1]} : vector<16x128xf32> to vector<1x128xf32>
    %64 = vector.extract_strided_slice %6 {offsets = [1, 0], sizes = [7, 128], strides = [1, 1]} : vector<8x128xf32> to vector<7x128xf32>
    %65 = tpu.concatenate %64, %5 in 0 : vector<7x128xf32>, vector<1x128xf32> -> vector<8x128xf32>
    %66 = vector.broadcast %63 : vector<1x128xf32> to vector<8x128xf32>
    %67 = arith.mulf %66, %65 : vector<8x128xf32>
    %68 = arith.addf %62, %67 : vector<8x128xf32>
    %69 = vector.extract_strided_slice %7 {offsets = [3, 0], sizes = [1, 128], strides = [1, 1]} : vector<16x128xf32> to vector<1x128xf32>
    %70 = vector.extract_strided_slice %6 {offsets = [1, 0], sizes = [7, 128], strides = [1, 1]} : vector<8x128xf32> to vector<7x128xf32>
    %71 = tpu.concatenate %70, %5 in 0 : vector<7x128xf32>, vector<1x128xf32> -> vector<8x128xf32>
    %c16_i32_14 = arith.constant 16 : i32
    %72 = tpu.dynamic_rotate %71 by %c16_i32_14 dim 1 : vector<8x128xf32>, i32 -> vector<8x128xf32>
    %cst_15 = arith.constant 0.000000e+00 : f32
    %73 = vector.broadcast %cst_15 : f32 to vector<8x128xf32>
    %74 = arith.select %4, %72, %73 : vector<8x128xi1>, vector<8x128xf32>
    %75 = vector.broadcast %69 : vector<1x128xf32> to vector<8x128xf32>
    %76 = arith.mulf %75, %74 : vector<8x128xf32>
    %77 = arith.addf %68, %76 : vector<8x128xf32>
    %78 = vector.extract_strided_slice %7 {offsets = [9, 0], sizes = [1, 128], strides = [1, 1]} : vector<16x128xf32> to vector<1x128xf32>
    %79 = vector.broadcast %78 : vector<1x128xf32> to vector<8x128xf32>
    %80 = arith.mulf %79, %6 : vector<8x128xf32>
    %81 = arith.addf %77, %80 : vector<8x128xf32>
    %82 = vector.extract_strided_slice %7 {offsets = [11, 0], sizes = [1, 128], strides = [1, 1]} : vector<16x128xf32> to vector<1x128xf32>
    %c16_i32_16 = arith.constant 16 : i32
    %83 = tpu.dynamic_rotate %6 by %c16_i32_16 dim 1 : vector<8x128xf32>, i32 -> vector<8x128xf32>
    %cst_17 = arith.constant 0.000000e+00 : f32
    %84 = vector.broadcast %cst_17 : f32 to vector<8x128xf32>
    %85 = arith.select %4, %83, %84 : vector<8x128xi1>, vector<8x128xf32>
    %86 = vector.broadcast %82 : vector<1x128xf32> to vector<8x128xf32>
    %87 = arith.mulf %86, %85 : vector<8x128xf32>
    %88 = arith.addf %81, %87 : vector<8x128xf32>
    %cst_18 = arith.constant 0.000000e+00 : f32
    %89 = vector.broadcast %cst_18 : f32 to vector<8x128xf32>
    %90 = vector.extract_strided_slice %7 {offsets = [0, 0], sizes = [1, 128], strides = [1, 1]} : vector<16x128xf32> to vector<1x128xf32>
    %91 = vector.extract_strided_slice %6 {offsets = [1, 0], sizes = [7, 128], strides = [1, 1]} : vector<8x128xf32> to vector<7x128xf32>
    %92 = tpu.concatenate %91, %5 in 0 : vector<7x128xf32>, vector<1x128xf32> -> vector<8x128xf32>
    %c112_i32_19 = arith.constant 112 : i32
    %93 = tpu.dynamic_rotate %92 by %c112_i32_19 dim 1 : vector<8x128xf32>, i32 -> vector<8x128xf32>
    %cst_20 = arith.constant 0.000000e+00 : f32
    %94 = vector.broadcast %cst_20 : f32 to vector<8x128xf32>
    %95 = arith.select %2, %93, %94 : vector<8x128xi1>, vector<8x128xf32>
    %96 = vector.broadcast %90 : vector<1x128xf32> to vector<8x128xf32>
    %97 = arith.mulf %96, %95 : vector<8x128xf32>
    %98 = arith.addf %89, %97 : vector<8x128xf32>
    %99 = vector.extract_strided_slice %7 {offsets = [2, 0], sizes = [1, 128], strides = [1, 1]} : vector<16x128xf32> to vector<1x128xf32>
    %100 = vector.extract_strided_slice %6 {offsets = [1, 0], sizes = [7, 128], strides = [1, 1]} : vector<8x128xf32> to vector<7x128xf32>
    %101 = tpu.concatenate %100, %5 in 0 : vector<7x128xf32>, vector<1x128xf32> -> vector<8x128xf32>
    %102 = vector.broadcast %99 : vector<1x128xf32> to vector<8x128xf32>
    %103 = arith.mulf %102, %101 : vector<8x128xf32>
    %104 = arith.addf %98, %103 : vector<8x128xf32>
    %105 = vector.extract_strided_slice %7 {offsets = [8, 0], sizes = [1, 128], strides = [1, 1]} : vector<16x128xf32> to vector<1x128xf32>
    %c112_i32_21 = arith.constant 112 : i32
    %106 = tpu.dynamic_rotate %6 by %c112_i32_21 dim 1 : vector<8x128xf32>, i32 -> vector<8x128xf32>
    %cst_22 = arith.constant 0.000000e+00 : f32
    %107 = vector.broadcast %cst_22 : f32 to vector<8x128xf32>
    %108 = arith.select %2, %106, %107 : vector<8x128xi1>, vector<8x128xf32>
    %109 = vector.broadcast %105 : vector<1x128xf32> to vector<8x128xf32>
    %110 = arith.mulf %109, %108 : vector<8x128xf32>
    %111 = arith.addf %104, %110 : vector<8x128xf32>
    %112 = vector.extract_strided_slice %7 {offsets = [10, 0], sizes = [1, 128], strides = [1, 1]} : vector<16x128xf32> to vector<1x128xf32>
    %113 = vector.broadcast %112 : vector<1x128xf32> to vector<8x128xf32>
    %114 = arith.mulf %113, %6 : vector<8x128xf32>
    %115 = arith.addf %111, %114 : vector<8x128xf32>
    %c0_23 = arith.constant 0 : index
    %116 = memref.load %arg1[%c0_23] : memref<4xf32, #tpu.memory_space<smem>>
    %c0_24 = arith.constant 0 : index
    %c0_25 = arith.constant 0 : index
    %c0_26 = arith.constant 0 : index
    %117 = vector.load %arg4[%c0_24, %c0_25, %c0_26] : memref<2x16x128xf32, #tpu.memory_space<vmem>>, vector<1x16x128xf32>
    %118 = vector.shape_cast %117 : vector<1x16x128xf32> to vector<16x128xf32>
    %c0_27 = arith.constant 0 : index
    %c0_28 = arith.constant 0 : index
    %c0_29 = arith.constant 0 : index
    %119 = vector.load %arg5[%c0_27, %c0_28, %c0_29] : memref<2x16x128xf32, #tpu.memory_space<vmem>>, vector<1x16x128xf32>
    %120 = vector.shape_cast %119 : vector<1x16x128xf32> to vector<16x128xf32>
    %cst_30 = arith.constant 0.000000e+00 : f32
    %121 = vector.broadcast %cst_30 : f32 to vector<8x128xf32>
    %122 = arith.subf %121, %6 : vector<8x128xf32>
    %123 = vector.extract_strided_slice %118 {offsets = [5, 0], sizes = [1, 128], strides = [1, 1]} : vector<16x128xf32> to vector<1x128xf32>
    %124 = vector.broadcast %123 : vector<1x128xf32> to vector<8x128xf32>
    %125 = arith.mulf %124, %34 : vector<8x128xf32>
    %126 = arith.addf %122, %125 : vector<8x128xf32>
    %127 = vector.extract_strided_slice %118 {offsets = [7, 0], sizes = [1, 128], strides = [1, 1]} : vector<16x128xf32> to vector<1x128xf32>
    %c112_i32_31 = arith.constant 112 : i32
    %128 = tpu.dynamic_rotate %34 by %c112_i32_31 dim 1 : vector<8x128xf32>, i32 -> vector<8x128xf32>
    %cst_32 = arith.constant 0.000000e+00 : f32
    %129 = vector.broadcast %cst_32 : f32 to vector<8x128xf32>
    %130 = arith.select %2, %128, %129 : vector<8x128xi1>, vector<8x128xf32>
    %131 = vector.broadcast %127 : vector<1x128xf32> to vector<8x128xf32>
    %132 = arith.mulf %131, %130 : vector<8x128xf32>
    %133 = arith.addf %126, %132 : vector<8x128xf32>
    %134 = vector.extract_strided_slice %118 {offsets = [13, 0], sizes = [1, 128], strides = [1, 1]} : vector<16x128xf32> to vector<1x128xf32>
    %135 = vector.extract_strided_slice %34 {offsets = [1, 0], sizes = [7, 128], strides = [1, 1]} : vector<8x128xf32> to vector<7x128xf32>
    %136 = tpu.concatenate %135, %5 in 0 : vector<7x128xf32>, vector<1x128xf32> -> vector<8x128xf32>
    %137 = vector.broadcast %134 : vector<1x128xf32> to vector<8x128xf32>
    %138 = arith.mulf %137, %136 : vector<8x128xf32>
    %139 = arith.addf %133, %138 : vector<8x128xf32>
    %140 = vector.extract_strided_slice %118 {offsets = [15, 0], sizes = [1, 128], strides = [1, 1]} : vector<16x128xf32> to vector<1x128xf32>
    %141 = vector.extract_strided_slice %34 {offsets = [1, 0], sizes = [7, 128], strides = [1, 1]} : vector<8x128xf32> to vector<7x128xf32>
    %142 = tpu.concatenate %141, %5 in 0 : vector<7x128xf32>, vector<1x128xf32> -> vector<8x128xf32>
    %c112_i32_33 = arith.constant 112 : i32
    %143 = tpu.dynamic_rotate %142 by %c112_i32_33 dim 1 : vector<8x128xf32>, i32 -> vector<8x128xf32>
    %cst_34 = arith.constant 0.000000e+00 : f32
    %144 = vector.broadcast %cst_34 : f32 to vector<8x128xf32>
    %145 = arith.select %2, %143, %144 : vector<8x128xi1>, vector<8x128xf32>
    %146 = vector.broadcast %140 : vector<1x128xf32> to vector<8x128xf32>
    %147 = arith.mulf %146, %145 : vector<8x128xf32>
    %148 = arith.addf %139, %147 : vector<8x128xf32>
    %149 = vector.extract_strided_slice %118 {offsets = [4, 0], sizes = [1, 128], strides = [1, 1]} : vector<16x128xf32> to vector<1x128xf32>
    %c16_i32_35 = arith.constant 16 : i32
    %150 = tpu.dynamic_rotate %61 by %c16_i32_35 dim 1 : vector<8x128xf32>, i32 -> vector<8x128xf32>
    %cst_36 = arith.constant 0.000000e+00 : f32
    %151 = vector.broadcast %cst_36 : f32 to vector<8x128xf32>
    %152 = arith.select %4, %150, %151 : vector<8x128xi1>, vector<8x128xf32>
    %153 = vector.broadcast %149 : vector<1x128xf32> to vector<8x128xf32>
    %154 = arith.mulf %153, %152 : vector<8x128xf32>
    %155 = arith.addf %148, %154 : vector<8x128xf32>
    %156 = vector.extract_strided_slice %118 {offsets = [6, 0], sizes = [1, 128], strides = [1, 1]} : vector<16x128xf32> to vector<1x128xf32>
    %157 = vector.broadcast %156 : vector<1x128xf32> to vector<8x128xf32>
    %158 = arith.mulf %157, %61 : vector<8x128xf32>
    %159 = arith.addf %155, %158 : vector<8x128xf32>
    %160 = vector.extract_strided_slice %118 {offsets = [12, 0], sizes = [1, 128], strides = [1, 1]} : vector<16x128xf32> to vector<1x128xf32>
    %161 = vector.extract_strided_slice %61 {offsets = [1, 0], sizes = [7, 128], strides = [1, 1]} : vector<8x128xf32> to vector<7x128xf32>
    %162 = tpu.concatenate %161, %5 in 0 : vector<7x128xf32>, vector<1x128xf32> -> vector<8x128xf32>
    %c16_i32_37 = arith.constant 16 : i32
    %163 = tpu.dynamic_rotate %162 by %c16_i32_37 dim 1 : vector<8x128xf32>, i32 -> vector<8x128xf32>
    %cst_38 = arith.constant 0.000000e+00 : f32
    %164 = vector.broadcast %cst_38 : f32 to vector<8x128xf32>
    %165 = arith.select %4, %163, %164 : vector<8x128xi1>, vector<8x128xf32>
    %166 = vector.broadcast %160 : vector<1x128xf32> to vector<8x128xf32>
    %167 = arith.mulf %166, %165 : vector<8x128xf32>
    %168 = arith.addf %159, %167 : vector<8x128xf32>
    %169 = vector.extract_strided_slice %118 {offsets = [14, 0], sizes = [1, 128], strides = [1, 1]} : vector<16x128xf32> to vector<1x128xf32>
    %170 = vector.extract_strided_slice %61 {offsets = [1, 0], sizes = [7, 128], strides = [1, 1]} : vector<8x128xf32> to vector<7x128xf32>
    %171 = tpu.concatenate %170, %5 in 0 : vector<7x128xf32>, vector<1x128xf32> -> vector<8x128xf32>
    %172 = vector.broadcast %169 : vector<1x128xf32> to vector<8x128xf32>
    %173 = arith.mulf %172, %171 : vector<8x128xf32>
    %174 = arith.addf %168, %173 : vector<8x128xf32>
    %175 = vector.extract_strided_slice %118 {offsets = [1, 0], sizes = [1, 128], strides = [1, 1]} : vector<16x128xf32> to vector<1x128xf32>
    %176 = vector.extract_strided_slice %88 {offsets = [0, 0], sizes = [7, 128], strides = [1, 1]} : vector<8x128xf32> to vector<7x128xf32>
    %177 = tpu.concatenate %5, %176 in 0 : vector<1x128xf32>, vector<7x128xf32> -> vector<8x128xf32>
    %178 = vector.broadcast %175 : vector<1x128xf32> to vector<8x128xf32>
    %179 = arith.mulf %178, %177 : vector<8x128xf32>
    %180 = arith.addf %174, %179 : vector<8x128xf32>
    %181 = vector.extract_strided_slice %118 {offsets = [3, 0], sizes = [1, 128], strides = [1, 1]} : vector<16x128xf32> to vector<1x128xf32>
    %182 = vector.extract_strided_slice %88 {offsets = [0, 0], sizes = [7, 128], strides = [1, 1]} : vector<8x128xf32> to vector<7x128xf32>
    %183 = tpu.concatenate %5, %182 in 0 : vector<1x128xf32>, vector<7x128xf32> -> vector<8x128xf32>
    %c112_i32_39 = arith.constant 112 : i32
    %184 = tpu.dynamic_rotate %183 by %c112_i32_39 dim 1 : vector<8x128xf32>, i32 -> vector<8x128xf32>
    %cst_40 = arith.constant 0.000000e+00 : f32
    %185 = vector.broadcast %cst_40 : f32 to vector<8x128xf32>
    %186 = arith.select %2, %184, %185 : vector<8x128xi1>, vector<8x128xf32>
    %187 = vector.broadcast %181 : vector<1x128xf32> to vector<8x128xf32>
    %188 = arith.mulf %187, %186 : vector<8x128xf32>
    %189 = arith.addf %180, %188 : vector<8x128xf32>
    %190 = vector.extract_strided_slice %118 {offsets = [9, 0], sizes = [1, 128], strides = [1, 1]} : vector<16x128xf32> to vector<1x128xf32>
    %191 = vector.broadcast %190 : vector<1x128xf32> to vector<8x128xf32>
    %192 = arith.mulf %191, %88 : vector<8x128xf32>
    %193 = arith.addf %189, %192 : vector<8x128xf32>
    %194 = vector.extract_strided_slice %118 {offsets = [11, 0], sizes = [1, 128], strides = [1, 1]} : vector<16x128xf32> to vector<1x128xf32>
    %c112_i32_41 = arith.constant 112 : i32
    %195 = tpu.dynamic_rotate %88 by %c112_i32_41 dim 1 : vector<8x128xf32>, i32 -> vector<8x128xf32>
    %cst_42 = arith.constant 0.000000e+00 : f32
    %196 = vector.broadcast %cst_42 : f32 to vector<8x128xf32>
    %197 = arith.select %2, %195, %196 : vector<8x128xi1>, vector<8x128xf32>
    %198 = vector.broadcast %194 : vector<1x128xf32> to vector<8x128xf32>
    %199 = arith.mulf %198, %197 : vector<8x128xf32>
    %200 = arith.addf %193, %199 : vector<8x128xf32>
    %201 = vector.extract_strided_slice %118 {offsets = [0, 0], sizes = [1, 128], strides = [1, 1]} : vector<16x128xf32> to vector<1x128xf32>
    %202 = vector.extract_strided_slice %115 {offsets = [0, 0], sizes = [7, 128], strides = [1, 1]} : vector<8x128xf32> to vector<7x128xf32>
    %203 = tpu.concatenate %5, %202 in 0 : vector<1x128xf32>, vector<7x128xf32> -> vector<8x128xf32>
    %c16_i32_43 = arith.constant 16 : i32
    %204 = tpu.dynamic_rotate %203 by %c16_i32_43 dim 1 : vector<8x128xf32>, i32 -> vector<8x128xf32>
    %cst_44 = arith.constant 0.000000e+00 : f32
    %205 = vector.broadcast %cst_44 : f32 to vector<8x128xf32>
    %206 = arith.select %4, %204, %205 : vector<8x128xi1>, vector<8x128xf32>
    %207 = vector.broadcast %201 : vector<1x128xf32> to vector<8x128xf32>
    %208 = arith.mulf %207, %206 : vector<8x128xf32>
    %209 = arith.addf %200, %208 : vector<8x128xf32>
    %210 = vector.extract_strided_slice %118 {offsets = [2, 0], sizes = [1, 128], strides = [1, 1]} : vector<16x128xf32> to vector<1x128xf32>
    %211 = vector.extract_strided_slice %115 {offsets = [0, 0], sizes = [7, 128], strides = [1, 1]} : vector<8x128xf32> to vector<7x128xf32>
    %212 = tpu.concatenate %5, %211 in 0 : vector<1x128xf32>, vector<7x128xf32> -> vector<8x128xf32>
    %213 = vector.broadcast %210 : vector<1x128xf32> to vector<8x128xf32>
    %214 = arith.mulf %213, %212 : vector<8x128xf32>
    %215 = arith.addf %209, %214 : vector<8x128xf32>
    %216 = vector.extract_strided_slice %118 {offsets = [8, 0], sizes = [1, 128], strides = [1, 1]} : vector<16x128xf32> to vector<1x128xf32>
    %c16_i32_45 = arith.constant 16 : i32
    %217 = tpu.dynamic_rotate %115 by %c16_i32_45 dim 1 : vector<8x128xf32>, i32 -> vector<8x128xf32>
    %cst_46 = arith.constant 0.000000e+00 : f32
    %218 = vector.broadcast %cst_46 : f32 to vector<8x128xf32>
    %219 = arith.select %4, %217, %218 : vector<8x128xi1>, vector<8x128xf32>
    %220 = vector.broadcast %216 : vector<1x128xf32> to vector<8x128xf32>
    %221 = arith.mulf %220, %219 : vector<8x128xf32>
    %222 = arith.addf %215, %221 : vector<8x128xf32>
    %223 = vector.extract_strided_slice %118 {offsets = [10, 0], sizes = [1, 128], strides = [1, 1]} : vector<16x128xf32> to vector<1x128xf32>
    %224 = vector.broadcast %223 : vector<1x128xf32> to vector<8x128xf32>
    %225 = arith.mulf %224, %115 : vector<8x128xf32>
    %226 = arith.addf %222, %225 : vector<8x128xf32>
    %cst_47 = arith.constant 0.000000e+00 : f32
    %227 = vector.broadcast %cst_47 : f32 to vector<8x128xf32>
    %228 = vector.extract_strided_slice %120 {offsets = [5, 0], sizes = [1, 128], strides = [1, 1]} : vector<16x128xf32> to vector<1x128xf32>
    %229 = vector.broadcast %228 : vector<1x128xf32> to vector<8x128xf32>
    %230 = arith.mulf %229, %226 : vector<8x128xf32>
    %231 = arith.addf %227, %230 : vector<8x128xf32>
    %232 = vector.extract_strided_slice %120 {offsets = [7, 0], sizes = [1, 128], strides = [1, 1]} : vector<16x128xf32> to vector<1x128xf32>
    %c16_i32_48 = arith.constant 16 : i32
    %233 = tpu.dynamic_rotate %226 by %c16_i32_48 dim 1 : vector<8x128xf32>, i32 -> vector<8x128xf32>
    %cst_49 = arith.constant 0.000000e+00 : f32
    %234 = vector.broadcast %cst_49 : f32 to vector<8x128xf32>
    %235 = arith.select %4, %233, %234 : vector<8x128xi1>, vector<8x128xf32>
    %236 = vector.broadcast %232 : vector<1x128xf32> to vector<8x128xf32>
    %237 = arith.mulf %236, %235 : vector<8x128xf32>
    %238 = arith.addf %231, %237 : vector<8x128xf32>
    %239 = vector.extract_strided_slice %120 {offsets = [13, 0], sizes = [1, 128], strides = [1, 1]} : vector<16x128xf32> to vector<1x128xf32>
    %240 = vector.extract_strided_slice %226 {offsets = [0, 0], sizes = [7, 128], strides = [1, 1]} : vector<8x128xf32> to vector<7x128xf32>
    %241 = tpu.concatenate %5, %240 in 0 : vector<1x128xf32>, vector<7x128xf32> -> vector<8x128xf32>
    %242 = vector.broadcast %239 : vector<1x128xf32> to vector<8x128xf32>
    %243 = arith.mulf %242, %241 : vector<8x128xf32>
    %244 = arith.addf %238, %243 : vector<8x128xf32>
    %245 = vector.extract_strided_slice %120 {offsets = [15, 0], sizes = [1, 128], strides = [1, 1]} : vector<16x128xf32> to vector<1x128xf32>
    %246 = vector.extract_strided_slice %226 {offsets = [0, 0], sizes = [7, 128], strides = [1, 1]} : vector<8x128xf32> to vector<7x128xf32>
    %247 = tpu.concatenate %5, %246 in 0 : vector<1x128xf32>, vector<7x128xf32> -> vector<8x128xf32>
    %c16_i32_50 = arith.constant 16 : i32
    %248 = tpu.dynamic_rotate %247 by %c16_i32_50 dim 1 : vector<8x128xf32>, i32 -> vector<8x128xf32>
    %cst_51 = arith.constant 0.000000e+00 : f32
    %249 = vector.broadcast %cst_51 : f32 to vector<8x128xf32>
    %250 = arith.select %4, %248, %249 : vector<8x128xi1>, vector<8x128xf32>
    %251 = vector.broadcast %245 : vector<1x128xf32> to vector<8x128xf32>
    %252 = arith.mulf %251, %250 : vector<8x128xf32>
    %253 = arith.addf %244, %252 : vector<8x128xf32>
    %cst_52 = arith.constant 0.000000e+00 : f32
    %254 = vector.broadcast %cst_52 : f32 to vector<8x128xf32>
    %255 = vector.extract_strided_slice %120 {offsets = [4, 0], sizes = [1, 128], strides = [1, 1]} : vector<16x128xf32> to vector<1x128xf32>
    %c112_i32_53 = arith.constant 112 : i32
    %256 = tpu.dynamic_rotate %226 by %c112_i32_53 dim 1 : vector<8x128xf32>, i32 -> vector<8x128xf32>
    %cst_54 = arith.constant 0.000000e+00 : f32
    %257 = vector.broadcast %cst_54 : f32 to vector<8x128xf32>
    %258 = arith.select %2, %256, %257 : vector<8x128xi1>, vector<8x128xf32>
    %259 = vector.broadcast %255 : vector<1x128xf32> to vector<8x128xf32>
    %260 = arith.mulf %259, %258 : vector<8x128xf32>
    %261 = arith.addf %254, %260 : vector<8x128xf32>
    %262 = vector.extract_strided_slice %120 {offsets = [6, 0], sizes = [1, 128], strides = [1, 1]} : vector<16x128xf32> to vector<1x128xf32>
    %263 = vector.broadcast %262 : vector<1x128xf32> to vector<8x128xf32>
    %264 = arith.mulf %263, %226 : vector<8x128xf32>
    %265 = arith.addf %261, %264 : vector<8x128xf32>
    %266 = vector.extract_strided_slice %120 {offsets = [12, 0], sizes = [1, 128], strides = [1, 1]} : vector<16x128xf32> to vector<1x128xf32>
    %267 = vector.extract_strided_slice %226 {offsets = [0, 0], sizes = [7, 128], strides = [1, 1]} : vector<8x128xf32> to vector<7x128xf32>
    %268 = tpu.concatenate %5, %267 in 0 : vector<1x128xf32>, vector<7x128xf32> -> vector<8x128xf32>
    %c112_i32_55 = arith.constant 112 : i32
    %269 = tpu.dynamic_rotate %268 by %c112_i32_55 dim 1 : vector<8x128xf32>, i32 -> vector<8x128xf32>
    %cst_56 = arith.constant 0.000000e+00 : f32
    %270 = vector.broadcast %cst_56 : f32 to vector<8x128xf32>
    %271 = arith.select %2, %269, %270 : vector<8x128xi1>, vector<8x128xf32>
    %272 = vector.broadcast %266 : vector<1x128xf32> to vector<8x128xf32>
    %273 = arith.mulf %272, %271 : vector<8x128xf32>
    %274 = arith.addf %265, %273 : vector<8x128xf32>
    %275 = vector.extract_strided_slice %120 {offsets = [14, 0], sizes = [1, 128], strides = [1, 1]} : vector<16x128xf32> to vector<1x128xf32>
    %276 = vector.extract_strided_slice %226 {offsets = [0, 0], sizes = [7, 128], strides = [1, 1]} : vector<8x128xf32> to vector<7x128xf32>
    %277 = tpu.concatenate %5, %276 in 0 : vector<1x128xf32>, vector<7x128xf32> -> vector<8x128xf32>
    %278 = vector.broadcast %275 : vector<1x128xf32> to vector<8x128xf32>
    %279 = arith.mulf %278, %277 : vector<8x128xf32>
    %280 = arith.addf %274, %279 : vector<8x128xf32>
    %cst_57 = arith.constant 0.000000e+00 : f32
    %281 = vector.broadcast %cst_57 : f32 to vector<8x128xf32>
    %282 = vector.extract_strided_slice %120 {offsets = [1, 0], sizes = [1, 128], strides = [1, 1]} : vector<16x128xf32> to vector<1x128xf32>
    %283 = vector.extract_strided_slice %226 {offsets = [1, 0], sizes = [7, 128], strides = [1, 1]} : vector<8x128xf32> to vector<7x128xf32>
    %284 = tpu.concatenate %283, %5 in 0 : vector<7x128xf32>, vector<1x128xf32> -> vector<8x128xf32>
    %285 = vector.broadcast %282 : vector<1x128xf32> to vector<8x128xf32>
    %286 = arith.mulf %285, %284 : vector<8x128xf32>
    %287 = arith.addf %281, %286 : vector<8x128xf32>
    %288 = vector.extract_strided_slice %120 {offsets = [3, 0], sizes = [1, 128], strides = [1, 1]} : vector<16x128xf32> to vector<1x128xf32>
    %289 = vector.extract_strided_slice %226 {offsets = [1, 0], sizes = [7, 128], strides = [1, 1]} : vector<8x128xf32> to vector<7x128xf32>
    %290 = tpu.concatenate %289, %5 in 0 : vector<7x128xf32>, vector<1x128xf32> -> vector<8x128xf32>
    %c16_i32_58 = arith.constant 16 : i32
    %291 = tpu.dynamic_rotate %290 by %c16_i32_58 dim 1 : vector<8x128xf32>, i32 -> vector<8x128xf32>
    %cst_59 = arith.constant 0.000000e+00 : f32
    %292 = vector.broadcast %cst_59 : f32 to vector<8x128xf32>
    %293 = arith.select %4, %291, %292 : vector<8x128xi1>, vector<8x128xf32>
    %294 = vector.broadcast %288 : vector<1x128xf32> to vector<8x128xf32>
    %295 = arith.mulf %294, %293 : vector<8x128xf32>
    %296 = arith.addf %287, %295 : vector<8x128xf32>
    %297 = vector.extract_strided_slice %120 {offsets = [9, 0], sizes = [1, 128], strides = [1, 1]} : vector<16x128xf32> to vector<1x128xf32>
    %298 = vector.broadcast %297 : vector<1x128xf32> to vector<8x128xf32>
    %299 = arith.mulf %298, %226 : vector<8x128xf32>
    %300 = arith.addf %296, %299 : vector<8x128xf32>
    %301 = vector.extract_strided_slice %120 {offsets = [11, 0], sizes = [1, 128], strides = [1, 1]} : vector<16x128xf32> to vector<1x128xf32>
    %c16_i32_60 = arith.constant 16 : i32
    %302 = tpu.dynamic_rotate %226 by %c16_i32_60 dim 1 : vector<8x128xf32>, i32 -> vector<8x128xf32>
    %cst_61 = arith.constant 0.000000e+00 : f32
    %303 = vector.broadcast %cst_61 : f32 to vector<8x128xf32>
    %304 = arith.select %4, %302, %303 : vector<8x128xi1>, vector<8x128xf32>
    %305 = vector.broadcast %301 : vector<1x128xf32> to vector<8x128xf32>
    %306 = arith.mulf %305, %304 : vector<8x128xf32>
    %307 = arith.addf %300, %306 : vector<8x128xf32>
    %cst_62 = arith.constant 0.000000e+00 : f32
    %308 = vector.broadcast %cst_62 : f32 to vector<8x128xf32>
    %309 = vector.extract_strided_slice %120 {offsets = [0, 0], sizes = [1, 128], strides = [1, 1]} : vector<16x128xf32> to vector<1x128xf32>
    %310 = vector.extract_strided_slice %226 {offsets = [1, 0], sizes = [7, 128], strides = [1, 1]} : vector<8x128xf32> to vector<7x128xf32>
    %311 = tpu.concatenate %310, %5 in 0 : vector<7x128xf32>, vector<1x128xf32> -> vector<8x128xf32>
    %c112_i32_63 = arith.constant 112 : i32
    %312 = tpu.dynamic_rotate %311 by %c112_i32_63 dim 1 : vector<8x128xf32>, i32 -> vector<8x128xf32>
    %cst_64 = arith.constant 0.000000e+00 : f32
    %313 = vector.broadcast %cst_64 : f32 to vector<8x128xf32>
    %314 = arith.select %2, %312, %313 : vector<8x128xi1>, vector<8x128xf32>
    %315 = vector.broadcast %309 : vector<1x128xf32> to vector<8x128xf32>
    %316 = arith.mulf %315, %314 : vector<8x128xf32>
    %317 = arith.addf %308, %316 : vector<8x128xf32>
    %318 = vector.extract_strided_slice %120 {offsets = [2, 0], sizes = [1, 128], strides = [1, 1]} : vector<16x128xf32> to vector<1x128xf32>
    %319 = vector.extract_strided_slice %226 {offsets = [1, 0], sizes = [7, 128], strides = [1, 1]} : vector<8x128xf32> to vector<7x128xf32>
    %320 = tpu.concatenate %319, %5 in 0 : vector<7x128xf32>, vector<1x128xf32> -> vector<8x128xf32>
    %321 = vector.broadcast %318 : vector<1x128xf32> to vector<8x128xf32>
    %322 = arith.mulf %321, %320 : vector<8x128xf32>
    %323 = arith.addf %317, %322 : vector<8x128xf32>
    %324 = vector.extract_strided_slice %120 {offsets = [8, 0], sizes = [1, 128], strides = [1, 1]} : vector<16x128xf32> to vector<1x128xf32>
    %c112_i32_65 = arith.constant 112 : i32
    %325 = tpu.dynamic_rotate %226 by %c112_i32_65 dim 1 : vector<8x128xf32>, i32 -> vector<8x128xf32>
    %cst_66 = arith.constant 0.000000e+00 : f32
    %326 = vector.broadcast %cst_66 : f32 to vector<8x128xf32>
    %327 = arith.select %2, %325, %326 : vector<8x128xi1>, vector<8x128xf32>
    %328 = vector.broadcast %324 : vector<1x128xf32> to vector<8x128xf32>
    %329 = arith.mulf %328, %327 : vector<8x128xf32>
    %330 = arith.addf %323, %329 : vector<8x128xf32>
    %331 = vector.extract_strided_slice %120 {offsets = [10, 0], sizes = [1, 128], strides = [1, 1]} : vector<16x128xf32> to vector<1x128xf32>
    %332 = vector.broadcast %331 : vector<1x128xf32> to vector<8x128xf32>
    %333 = arith.mulf %332, %226 : vector<8x128xf32>
    %334 = arith.addf %330, %333 : vector<8x128xf32>
    %335 = vector.broadcast %116 : f32 to vector<8x128xf32>
    %336 = arith.mulf %335, %253 : vector<8x128xf32>
    %337 = arith.subf %34, %336 : vector<8x128xf32>
    %338 = vector.broadcast %116 : f32 to vector<8x128xf32>
    %339 = arith.mulf %338, %280 : vector<8x128xf32>
    %340 = arith.subf %61, %339 : vector<8x128xf32>
    %341 = vector.broadcast %116 : f32 to vector<8x128xf32>
    %342 = arith.mulf %341, %307 : vector<8x128xf32>
    %343 = arith.subf %88, %342 : vector<8x128xf32>
    %344 = vector.broadcast %116 : f32 to vector<8x128xf32>
    %345 = arith.mulf %344, %334 : vector<8x128xf32>
    %346 = arith.subf %115, %345 : vector<8x128xf32>
    %c2 = arith.constant 2 : index
    %347 = memref.load %arg1[%c2] : memref<4xf32, #tpu.memory_space<smem>>
    %c1 = arith.constant 1 : index
    %c0_67 = arith.constant 0 : index
    %c0_68 = arith.constant 0 : index
    %348 = vector.load %arg4[%c1, %c0_67, %c0_68] : memref<2x16x128xf32, #tpu.memory_space<vmem>>, vector<1x16x128xf32>
    %349 = vector.shape_cast %348 : vector<1x16x128xf32> to vector<16x128xf32>
    %c1_69 = arith.constant 1 : index
    %c0_70 = arith.constant 0 : index
    %c0_71 = arith.constant 0 : index
    %350 = vector.load %arg5[%c1_69, %c0_70, %c0_71] : memref<2x16x128xf32, #tpu.memory_space<vmem>>, vector<1x16x128xf32>
    %351 = vector.shape_cast %350 : vector<1x16x128xf32> to vector<16x128xf32>
    %cst_72 = arith.constant 0.000000e+00 : f32
    %352 = vector.broadcast %cst_72 : f32 to vector<8x128xf32>
    %353 = arith.subf %352, %6 : vector<8x128xf32>
    %354 = vector.extract_strided_slice %349 {offsets = [5, 0], sizes = [1, 128], strides = [1, 1]} : vector<16x128xf32> to vector<1x128xf32>
    %355 = vector.broadcast %354 : vector<1x128xf32> to vector<8x128xf32>
    %356 = arith.mulf %355, %337 : vector<8x128xf32>
    %357 = arith.addf %353, %356 : vector<8x128xf32>
    %358 = vector.extract_strided_slice %349 {offsets = [7, 0], sizes = [1, 128], strides = [1, 1]} : vector<16x128xf32> to vector<1x128xf32>
    %c112_i32_73 = arith.constant 112 : i32
    %359 = tpu.dynamic_rotate %337 by %c112_i32_73 dim 1 : vector<8x128xf32>, i32 -> vector<8x128xf32>
    %cst_74 = arith.constant 0.000000e+00 : f32
    %360 = vector.broadcast %cst_74 : f32 to vector<8x128xf32>
    %361 = arith.select %2, %359, %360 : vector<8x128xi1>, vector<8x128xf32>
    %362 = vector.broadcast %358 : vector<1x128xf32> to vector<8x128xf32>
    %363 = arith.mulf %362, %361 : vector<8x128xf32>
    %364 = arith.addf %357, %363 : vector<8x128xf32>
    %365 = vector.extract_strided_slice %349 {offsets = [13, 0], sizes = [1, 128], strides = [1, 1]} : vector<16x128xf32> to vector<1x128xf32>
    %366 = vector.extract_strided_slice %337 {offsets = [1, 0], sizes = [7, 128], strides = [1, 1]} : vector<8x128xf32> to vector<7x128xf32>
    %367 = tpu.concatenate %366, %5 in 0 : vector<7x128xf32>, vector<1x128xf32> -> vector<8x128xf32>
    %368 = vector.broadcast %365 : vector<1x128xf32> to vector<8x128xf32>
    %369 = arith.mulf %368, %367 : vector<8x128xf32>
    %370 = arith.addf %364, %369 : vector<8x128xf32>
    %371 = vector.extract_strided_slice %349 {offsets = [15, 0], sizes = [1, 128], strides = [1, 1]} : vector<16x128xf32> to vector<1x128xf32>
    %372 = vector.extract_strided_slice %337 {offsets = [1, 0], sizes = [7, 128], strides = [1, 1]} : vector<8x128xf32> to vector<7x128xf32>
    %373 = tpu.concatenate %372, %5 in 0 : vector<7x128xf32>, vector<1x128xf32> -> vector<8x128xf32>
    %c112_i32_75 = arith.constant 112 : i32
    %374 = tpu.dynamic_rotate %373 by %c112_i32_75 dim 1 : vector<8x128xf32>, i32 -> vector<8x128xf32>
    %cst_76 = arith.constant 0.000000e+00 : f32
    %375 = vector.broadcast %cst_76 : f32 to vector<8x128xf32>
    %376 = arith.select %2, %374, %375 : vector<8x128xi1>, vector<8x128xf32>
    %377 = vector.broadcast %371 : vector<1x128xf32> to vector<8x128xf32>
    %378 = arith.mulf %377, %376 : vector<8x128xf32>
    %379 = arith.addf %370, %378 : vector<8x128xf32>
    %380 = vector.extract_strided_slice %349 {offsets = [4, 0], sizes = [1, 128], strides = [1, 1]} : vector<16x128xf32> to vector<1x128xf32>
    %c16_i32_77 = arith.constant 16 : i32
    %381 = tpu.dynamic_rotate %340 by %c16_i32_77 dim 1 : vector<8x128xf32>, i32 -> vector<8x128xf32>
    %cst_78 = arith.constant 0.000000e+00 : f32
    %382 = vector.broadcast %cst_78 : f32 to vector<8x128xf32>
    %383 = arith.select %4, %381, %382 : vector<8x128xi1>, vector<8x128xf32>
    %384 = vector.broadcast %380 : vector<1x128xf32> to vector<8x128xf32>
    %385 = arith.mulf %384, %383 : vector<8x128xf32>
    %386 = arith.addf %379, %385 : vector<8x128xf32>
    %387 = vector.extract_strided_slice %349 {offsets = [6, 0], sizes = [1, 128], strides = [1, 1]} : vector<16x128xf32> to vector<1x128xf32>
    %388 = vector.broadcast %387 : vector<1x128xf32> to vector<8x128xf32>
    %389 = arith.mulf %388, %340 : vector<8x128xf32>
    %390 = arith.addf %386, %389 : vector<8x128xf32>
    %391 = vector.extract_strided_slice %349 {offsets = [12, 0], sizes = [1, 128], strides = [1, 1]} : vector<16x128xf32> to vector<1x128xf32>
    %392 = vector.extract_strided_slice %340 {offsets = [1, 0], sizes = [7, 128], strides = [1, 1]} : vector<8x128xf32> to vector<7x128xf32>
    %393 = tpu.concatenate %392, %5 in 0 : vector<7x128xf32>, vector<1x128xf32> -> vector<8x128xf32>
    %c16_i32_79 = arith.constant 16 : i32
    %394 = tpu.dynamic_rotate %393 by %c16_i32_79 dim 1 : vector<8x128xf32>, i32 -> vector<8x128xf32>
    %cst_80 = arith.constant 0.000000e+00 : f32
    %395 = vector.broadcast %cst_80 : f32 to vector<8x128xf32>
    %396 = arith.select %4, %394, %395 : vector<8x128xi1>, vector<8x128xf32>
    %397 = vector.broadcast %391 : vector<1x128xf32> to vector<8x128xf32>
    %398 = arith.mulf %397, %396 : vector<8x128xf32>
    %399 = arith.addf %390, %398 : vector<8x128xf32>
    %400 = vector.extract_strided_slice %349 {offsets = [14, 0], sizes = [1, 128], strides = [1, 1]} : vector<16x128xf32> to vector<1x128xf32>
    %401 = vector.extract_strided_slice %340 {offsets = [1, 0], sizes = [7, 128], strides = [1, 1]} : vector<8x128xf32> to vector<7x128xf32>
    %402 = tpu.concatenate %401, %5 in 0 : vector<7x128xf32>, vector<1x128xf32> -> vector<8x128xf32>
    %403 = vector.broadcast %400 : vector<1x128xf32> to vector<8x128xf32>
    %404 = arith.mulf %403, %402 : vector<8x128xf32>
    %405 = arith.addf %399, %404 : vector<8x128xf32>
    %406 = vector.extract_strided_slice %349 {offsets = [1, 0], sizes = [1, 128], strides = [1, 1]} : vector<16x128xf32> to vector<1x128xf32>
    %407 = vector.extract_strided_slice %343 {offsets = [0, 0], sizes = [7, 128], strides = [1, 1]} : vector<8x128xf32> to vector<7x128xf32>
    %408 = tpu.concatenate %5, %407 in 0 : vector<1x128xf32>, vector<7x128xf32> -> vector<8x128xf32>
    %409 = vector.broadcast %406 : vector<1x128xf32> to vector<8x128xf32>
    %410 = arith.mulf %409, %408 : vector<8x128xf32>
    %411 = arith.addf %405, %410 : vector<8x128xf32>
    %412 = vector.extract_strided_slice %349 {offsets = [3, 0], sizes = [1, 128], strides = [1, 1]} : vector<16x128xf32> to vector<1x128xf32>
    %413 = vector.extract_strided_slice %343 {offsets = [0, 0], sizes = [7, 128], strides = [1, 1]} : vector<8x128xf32> to vector<7x128xf32>
    %414 = tpu.concatenate %5, %413 in 0 : vector<1x128xf32>, vector<7x128xf32> -> vector<8x128xf32>
    %c112_i32_81 = arith.constant 112 : i32
    %415 = tpu.dynamic_rotate %414 by %c112_i32_81 dim 1 : vector<8x128xf32>, i32 -> vector<8x128xf32>
    %cst_82 = arith.constant 0.000000e+00 : f32
    %416 = vector.broadcast %cst_82 : f32 to vector<8x128xf32>
    %417 = arith.select %2, %415, %416 : vector<8x128xi1>, vector<8x128xf32>
    %418 = vector.broadcast %412 : vector<1x128xf32> to vector<8x128xf32>
    %419 = arith.mulf %418, %417 : vector<8x128xf32>
    %420 = arith.addf %411, %419 : vector<8x128xf32>
    %421 = vector.extract_strided_slice %349 {offsets = [9, 0], sizes = [1, 128], strides = [1, 1]} : vector<16x128xf32> to vector<1x128xf32>
    %422 = vector.broadcast %421 : vector<1x128xf32> to vector<8x128xf32>
    %423 = arith.mulf %422, %343 : vector<8x128xf32>
    %424 = arith.addf %420, %423 : vector<8x128xf32>
    %425 = vector.extract_strided_slice %349 {offsets = [11, 0], sizes = [1, 128], strides = [1, 1]} : vector<16x128xf32> to vector<1x128xf32>
    %c112_i32_83 = arith.constant 112 : i32
    %426 = tpu.dynamic_rotate %343 by %c112_i32_83 dim 1 : vector<8x128xf32>, i32 -> vector<8x128xf32>
    %cst_84 = arith.constant 0.000000e+00 : f32
    %427 = vector.broadcast %cst_84 : f32 to vector<8x128xf32>
    %428 = arith.select %2, %426, %427 : vector<8x128xi1>, vector<8x128xf32>
    %429 = vector.broadcast %425 : vector<1x128xf32> to vector<8x128xf32>
    %430 = arith.mulf %429, %428 : vector<8x128xf32>
    %431 = arith.addf %424, %430 : vector<8x128xf32>
    %432 = vector.extract_strided_slice %349 {offsets = [0, 0], sizes = [1, 128], strides = [1, 1]} : vector<16x128xf32> to vector<1x128xf32>
    %433 = vector.extract_strided_slice %346 {offsets = [0, 0], sizes = [7, 128], strides = [1, 1]} : vector<8x128xf32> to vector<7x128xf32>
    %434 = tpu.concatenate %5, %433 in 0 : vector<1x128xf32>, vector<7x128xf32> -> vector<8x128xf32>
    %c16_i32_85 = arith.constant 16 : i32
    %435 = tpu.dynamic_rotate %434 by %c16_i32_85 dim 1 : vector<8x128xf32>, i32 -> vector<8x128xf32>
    %cst_86 = arith.constant 0.000000e+00 : f32
    %436 = vector.broadcast %cst_86 : f32 to vector<8x128xf32>
    %437 = arith.select %4, %435, %436 : vector<8x128xi1>, vector<8x128xf32>
    %438 = vector.broadcast %432 : vector<1x128xf32> to vector<8x128xf32>
    %439 = arith.mulf %438, %437 : vector<8x128xf32>
    %440 = arith.addf %431, %439 : vector<8x128xf32>
    %441 = vector.extract_strided_slice %349 {offsets = [2, 0], sizes = [1, 128], strides = [1, 1]} : vector<16x128xf32> to vector<1x128xf32>
    %442 = vector.extract_strided_slice %346 {offsets = [0, 0], sizes = [7, 128], strides = [1, 1]} : vector<8x128xf32> to vector<7x128xf32>
    %443 = tpu.concatenate %5, %442 in 0 : vector<1x128xf32>, vector<7x128xf32> -> vector<8x128xf32>
    %444 = vector.broadcast %441 : vector<1x128xf32> to vector<8x128xf32>
    %445 = arith.mulf %444, %443 : vector<8x128xf32>
    %446 = arith.addf %440, %445 : vector<8x128xf32>
    %447 = vector.extract_strided_slice %349 {offsets = [8, 0], sizes = [1, 128], strides = [1, 1]} : vector<16x128xf32> to vector<1x128xf32>
    %c16_i32_87 = arith.constant 16 : i32
    %448 = tpu.dynamic_rotate %346 by %c16_i32_87 dim 1 : vector<8x128xf32>, i32 -> vector<8x128xf32>
    %cst_88 = arith.constant 0.000000e+00 : f32
    %449 = vector.broadcast %cst_88 : f32 to vector<8x128xf32>
    %450 = arith.select %4, %448, %449 : vector<8x128xi1>, vector<8x128xf32>
    %451 = vector.broadcast %447 : vector<1x128xf32> to vector<8x128xf32>
    %452 = arith.mulf %451, %450 : vector<8x128xf32>
    %453 = arith.addf %446, %452 : vector<8x128xf32>
    %454 = vector.extract_strided_slice %349 {offsets = [10, 0], sizes = [1, 128], strides = [1, 1]} : vector<16x128xf32> to vector<1x128xf32>
    %455 = vector.broadcast %454 : vector<1x128xf32> to vector<8x128xf32>
    %456 = arith.mulf %455, %346 : vector<8x128xf32>
    %457 = arith.addf %453, %456 : vector<8x128xf32>
    %cst_89 = arith.constant 0.000000e+00 : f32
    %458 = vector.broadcast %cst_89 : f32 to vector<8x128xf32>
    %459 = vector.extract_strided_slice %351 {offsets = [5, 0], sizes = [1, 128], strides = [1, 1]} : vector<16x128xf32> to vector<1x128xf32>
    %460 = vector.broadcast %459 : vector<1x128xf32> to vector<8x128xf32>
    %461 = arith.mulf %460, %457 : vector<8x128xf32>
    %462 = arith.addf %458, %461 : vector<8x128xf32>
    %463 = vector.extract_strided_slice %351 {offsets = [7, 0], sizes = [1, 128], strides = [1, 1]} : vector<16x128xf32> to vector<1x128xf32>
    %c16_i32_90 = arith.constant 16 : i32
    %464 = tpu.dynamic_rotate %457 by %c16_i32_90 dim 1 : vector<8x128xf32>, i32 -> vector<8x128xf32>
    %cst_91 = arith.constant 0.000000e+00 : f32
    %465 = vector.broadcast %cst_91 : f32 to vector<8x128xf32>
    %466 = arith.select %4, %464, %465 : vector<8x128xi1>, vector<8x128xf32>
    %467 = vector.broadcast %463 : vector<1x128xf32> to vector<8x128xf32>
    %468 = arith.mulf %467, %466 : vector<8x128xf32>
    %469 = arith.addf %462, %468 : vector<8x128xf32>
    %470 = vector.extract_strided_slice %351 {offsets = [13, 0], sizes = [1, 128], strides = [1, 1]} : vector<16x128xf32> to vector<1x128xf32>
    %471 = vector.extract_strided_slice %457 {offsets = [0, 0], sizes = [7, 128], strides = [1, 1]} : vector<8x128xf32> to vector<7x128xf32>
    %472 = tpu.concatenate %5, %471 in 0 : vector<1x128xf32>, vector<7x128xf32> -> vector<8x128xf32>
    %473 = vector.broadcast %470 : vector<1x128xf32> to vector<8x128xf32>
    %474 = arith.mulf %473, %472 : vector<8x128xf32>
    %475 = arith.addf %469, %474 : vector<8x128xf32>
    %476 = vector.extract_strided_slice %351 {offsets = [15, 0], sizes = [1, 128], strides = [1, 1]} : vector<16x128xf32> to vector<1x128xf32>
    %477 = vector.extract_strided_slice %457 {offsets = [0, 0], sizes = [7, 128], strides = [1, 1]} : vector<8x128xf32> to vector<7x128xf32>
    %478 = tpu.concatenate %5, %477 in 0 : vector<1x128xf32>, vector<7x128xf32> -> vector<8x128xf32>
    %c16_i32_92 = arith.constant 16 : i32
    %479 = tpu.dynamic_rotate %478 by %c16_i32_92 dim 1 : vector<8x128xf32>, i32 -> vector<8x128xf32>
    %cst_93 = arith.constant 0.000000e+00 : f32
    %480 = vector.broadcast %cst_93 : f32 to vector<8x128xf32>
    %481 = arith.select %4, %479, %480 : vector<8x128xi1>, vector<8x128xf32>
    %482 = vector.broadcast %476 : vector<1x128xf32> to vector<8x128xf32>
    %483 = arith.mulf %482, %481 : vector<8x128xf32>
    %484 = arith.addf %475, %483 : vector<8x128xf32>
    %cst_94 = arith.constant 0.000000e+00 : f32
    %485 = vector.broadcast %cst_94 : f32 to vector<8x128xf32>
    %486 = vector.extract_strided_slice %351 {offsets = [4, 0], sizes = [1, 128], strides = [1, 1]} : vector<16x128xf32> to vector<1x128xf32>
    %c112_i32_95 = arith.constant 112 : i32
    %487 = tpu.dynamic_rotate %457 by %c112_i32_95 dim 1 : vector<8x128xf32>, i32 -> vector<8x128xf32>
    %cst_96 = arith.constant 0.000000e+00 : f32
    %488 = vector.broadcast %cst_96 : f32 to vector<8x128xf32>
    %489 = arith.select %2, %487, %488 : vector<8x128xi1>, vector<8x128xf32>
    %490 = vector.broadcast %486 : vector<1x128xf32> to vector<8x128xf32>
    %491 = arith.mulf %490, %489 : vector<8x128xf32>
    %492 = arith.addf %485, %491 : vector<8x128xf32>
    %493 = vector.extract_strided_slice %351 {offsets = [6, 0], sizes = [1, 128], strides = [1, 1]} : vector<16x128xf32> to vector<1x128xf32>
    %494 = vector.broadcast %493 : vector<1x128xf32> to vector<8x128xf32>
    %495 = arith.mulf %494, %457 : vector<8x128xf32>
    %496 = arith.addf %492, %495 : vector<8x128xf32>
    %497 = vector.extract_strided_slice %351 {offsets = [12, 0], sizes = [1, 128], strides = [1, 1]} : vector<16x128xf32> to vector<1x128xf32>
    %498 = vector.extract_strided_slice %457 {offsets = [0, 0], sizes = [7, 128], strides = [1, 1]} : vector<8x128xf32> to vector<7x128xf32>
    %499 = tpu.concatenate %5, %498 in 0 : vector<1x128xf32>, vector<7x128xf32> -> vector<8x128xf32>
    %c112_i32_97 = arith.constant 112 : i32
    %500 = tpu.dynamic_rotate %499 by %c112_i32_97 dim 1 : vector<8x128xf32>, i32 -> vector<8x128xf32>
    %cst_98 = arith.constant 0.000000e+00 : f32
    %501 = vector.broadcast %cst_98 : f32 to vector<8x128xf32>
    %502 = arith.select %2, %500, %501 : vector<8x128xi1>, vector<8x128xf32>
    %503 = vector.broadcast %497 : vector<1x128xf32> to vector<8x128xf32>
    %504 = arith.mulf %503, %502 : vector<8x128xf32>
    %505 = arith.addf %496, %504 : vector<8x128xf32>
    %506 = vector.extract_strided_slice %351 {offsets = [14, 0], sizes = [1, 128], strides = [1, 1]} : vector<16x128xf32> to vector<1x128xf32>
    %507 = vector.extract_strided_slice %457 {offsets = [0, 0], sizes = [7, 128], strides = [1, 1]} : vector<8x128xf32> to vector<7x128xf32>
    %508 = tpu.concatenate %5, %507 in 0 : vector<1x128xf32>, vector<7x128xf32> -> vector<8x128xf32>
    %509 = vector.broadcast %506 : vector<1x128xf32> to vector<8x128xf32>
    %510 = arith.mulf %509, %508 : vector<8x128xf32>
    %511 = arith.addf %505, %510 : vector<8x128xf32>
    %cst_99 = arith.constant 0.000000e+00 : f32
    %512 = vector.broadcast %cst_99 : f32 to vector<8x128xf32>
    %513 = vector.extract_strided_slice %351 {offsets = [1, 0], sizes = [1, 128], strides = [1, 1]} : vector<16x128xf32> to vector<1x128xf32>
    %514 = vector.extract_strided_slice %457 {offsets = [1, 0], sizes = [7, 128], strides = [1, 1]} : vector<8x128xf32> to vector<7x128xf32>
    %515 = tpu.concatenate %514, %5 in 0 : vector<7x128xf32>, vector<1x128xf32> -> vector<8x128xf32>
    %516 = vector.broadcast %513 : vector<1x128xf32> to vector<8x128xf32>
    %517 = arith.mulf %516, %515 : vector<8x128xf32>
    %518 = arith.addf %512, %517 : vector<8x128xf32>
    %519 = vector.extract_strided_slice %351 {offsets = [3, 0], sizes = [1, 128], strides = [1, 1]} : vector<16x128xf32> to vector<1x128xf32>
    %520 = vector.extract_strided_slice %457 {offsets = [1, 0], sizes = [7, 128], strides = [1, 1]} : vector<8x128xf32> to vector<7x128xf32>
    %521 = tpu.concatenate %520, %5 in 0 : vector<7x128xf32>, vector<1x128xf32> -> vector<8x128xf32>
    %c16_i32_100 = arith.constant 16 : i32
    %522 = tpu.dynamic_rotate %521 by %c16_i32_100 dim 1 : vector<8x128xf32>, i32 -> vector<8x128xf32>
    %cst_101 = arith.constant 0.000000e+00 : f32
    %523 = vector.broadcast %cst_101 : f32 to vector<8x128xf32>
    %524 = arith.select %4, %522, %523 : vector<8x128xi1>, vector<8x128xf32>
    %525 = vector.broadcast %519 : vector<1x128xf32> to vector<8x128xf32>
    %526 = arith.mulf %525, %524 : vector<8x128xf32>
    %527 = arith.addf %518, %526 : vector<8x128xf32>
    %528 = vector.extract_strided_slice %351 {offsets = [9, 0], sizes = [1, 128], strides = [1, 1]} : vector<16x128xf32> to vector<1x128xf32>
    %529 = vector.broadcast %528 : vector<1x128xf32> to vector<8x128xf32>
    %530 = arith.mulf %529, %457 : vector<8x128xf32>
    %531 = arith.addf %527, %530 : vector<8x128xf32>
    %532 = vector.extract_strided_slice %351 {offsets = [11, 0], sizes = [1, 128], strides = [1, 1]} : vector<16x128xf32> to vector<1x128xf32>
    %c16_i32_102 = arith.constant 16 : i32
    %533 = tpu.dynamic_rotate %457 by %c16_i32_102 dim 1 : vector<8x128xf32>, i32 -> vector<8x128xf32>
    %cst_103 = arith.constant 0.000000e+00 : f32
    %534 = vector.broadcast %cst_103 : f32 to vector<8x128xf32>
    %535 = arith.select %4, %533, %534 : vector<8x128xi1>, vector<8x128xf32>
    %536 = vector.broadcast %532 : vector<1x128xf32> to vector<8x128xf32>
    %537 = arith.mulf %536, %535 : vector<8x128xf32>
    %538 = arith.addf %531, %537 : vector<8x128xf32>
    %cst_104 = arith.constant 0.000000e+00 : f32
    %539 = vector.broadcast %cst_104 : f32 to vector<8x128xf32>
    %540 = vector.extract_strided_slice %351 {offsets = [0, 0], sizes = [1, 128], strides = [1, 1]} : vector<16x128xf32> to vector<1x128xf32>
    %541 = vector.extract_strided_slice %457 {offsets = [1, 0], sizes = [7, 128], strides = [1, 1]} : vector<8x128xf32> to vector<7x128xf32>
    %542 = tpu.concatenate %541, %5 in 0 : vector<7x128xf32>, vector<1x128xf32> -> vector<8x128xf32>
    %c112_i32_105 = arith.constant 112 : i32
    %543 = tpu.dynamic_rotate %542 by %c112_i32_105 dim 1 : vector<8x128xf32>, i32 -> vector<8x128xf32>
    %cst_106 = arith.constant 0.000000e+00 : f32
    %544 = vector.broadcast %cst_106 : f32 to vector<8x128xf32>
    %545 = arith.select %2, %543, %544 : vector<8x128xi1>, vector<8x128xf32>
    %546 = vector.broadcast %540 : vector<1x128xf32> to vector<8x128xf32>
    %547 = arith.mulf %546, %545 : vector<8x128xf32>
    %548 = arith.addf %539, %547 : vector<8x128xf32>
    %549 = vector.extract_strided_slice %351 {offsets = [2, 0], sizes = [1, 128], strides = [1, 1]} : vector<16x128xf32> to vector<1x128xf32>
    %550 = vector.extract_strided_slice %457 {offsets = [1, 0], sizes = [7, 128], strides = [1, 1]} : vector<8x128xf32> to vector<7x128xf32>
    %551 = tpu.concatenate %550, %5 in 0 : vector<7x128xf32>, vector<1x128xf32> -> vector<8x128xf32>
    %552 = vector.broadcast %549 : vector<1x128xf32> to vector<8x128xf32>
    %553 = arith.mulf %552, %551 : vector<8x128xf32>
    %554 = arith.addf %548, %553 : vector<8x128xf32>
    %555 = vector.extract_strided_slice %351 {offsets = [8, 0], sizes = [1, 128], strides = [1, 1]} : vector<16x128xf32> to vector<1x128xf32>
    %c112_i32_107 = arith.constant 112 : i32
    %556 = tpu.dynamic_rotate %457 by %c112_i32_107 dim 1 : vector<8x128xf32>, i32 -> vector<8x128xf32>
    %cst_108 = arith.constant 0.000000e+00 : f32
    %557 = vector.broadcast %cst_108 : f32 to vector<8x128xf32>
    %558 = arith.select %2, %556, %557 : vector<8x128xi1>, vector<8x128xf32>
    %559 = vector.broadcast %555 : vector<1x128xf32> to vector<8x128xf32>
    %560 = arith.mulf %559, %558 : vector<8x128xf32>
    %561 = arith.addf %554, %560 : vector<8x128xf32>
    %562 = vector.extract_strided_slice %351 {offsets = [10, 0], sizes = [1, 128], strides = [1, 1]} : vector<16x128xf32> to vector<1x128xf32>
    %563 = vector.broadcast %562 : vector<1x128xf32> to vector<8x128xf32>
    %564 = arith.mulf %563, %457 : vector<8x128xf32>
    %565 = arith.addf %561, %564 : vector<8x128xf32>
    %566 = vector.broadcast %347 : f32 to vector<8x128xf32>
    %567 = arith.mulf %566, %484 : vector<8x128xf32>
    %568 = arith.subf %337, %567 : vector<8x128xf32>
    %569 = vector.broadcast %347 : f32 to vector<8x128xf32>
    %570 = arith.mulf %569, %511 : vector<8x128xf32>
    %571 = arith.subf %340, %570 : vector<8x128xf32>
    %572 = vector.broadcast %347 : f32 to vector<8x128xf32>
    %573 = arith.mulf %572, %538 : vector<8x128xf32>
    %574 = arith.subf %343, %573 : vector<8x128xf32>
    %575 = vector.broadcast %347 : f32 to vector<8x128xf32>
    %576 = arith.mulf %575, %565 : vector<8x128xf32>
    %577 = arith.subf %346, %576 : vector<8x128xf32>
    %c0_109 = arith.constant 0 : index
    %c0_110 = arith.constant 0 : index
    %c0_111 = arith.constant 0 : index
    %578 = vector.load %arg6[%c0_109, %c0_110, %c0_111] : memref<4x8x128xf32, #tpu.memory_space<vmem>>, vector<1x8x128xf32>
    %579 = vector.shape_cast %578 : vector<1x8x128xf32> to vector<8x128xf32>
    %580 = vector.shape_cast %568 : vector<8x128xf32> to vector<1x8x128xf32>
    tpu.vector_store %arg6[%c0_109, %c0_110, %c0_111], %580 {strides = array<i32>} : memref<4x8x128xf32, #tpu.memory_space<vmem>>, vector<1x8x128xf32>,
    %c1_112 = arith.constant 1 : index
    %c0_113 = arith.constant 0 : index
    %c0_114 = arith.constant 0 : index
    %581 = vector.load %arg6[%c1_112, %c0_113, %c0_114] : memref<4x8x128xf32, #tpu.memory_space<vmem>>, vector<1x8x128xf32>
    %582 = vector.shape_cast %581 : vector<1x8x128xf32> to vector<8x128xf32>
    %583 = vector.shape_cast %571 : vector<8x128xf32> to vector<1x8x128xf32>
    tpu.vector_store %arg6[%c1_112, %c0_113, %c0_114], %583 {strides = array<i32>} : memref<4x8x128xf32, #tpu.memory_space<vmem>>, vector<1x8x128xf32>,
    %c2_115 = arith.constant 2 : index
    %c0_116 = arith.constant 0 : index
    %c0_117 = arith.constant 0 : index
    %584 = vector.load %arg6[%c2_115, %c0_116, %c0_117] : memref<4x8x128xf32, #tpu.memory_space<vmem>>, vector<1x8x128xf32>
    %585 = vector.shape_cast %584 : vector<1x8x128xf32> to vector<8x128xf32>
    %586 = vector.shape_cast %574 : vector<8x128xf32> to vector<1x8x128xf32>
    tpu.vector_store %arg6[%c2_115, %c0_116, %c0_117], %586 {strides = array<i32>} : memref<4x8x128xf32, #tpu.memory_space<vmem>>, vector<1x8x128xf32>,
    %c3 = arith.constant 3 : index
    %c0_118 = arith.constant 0 : index
    %c0_119 = arith.constant 0 : index
    %587 = vector.load %arg6[%c3, %c0_118, %c0_119] : memref<4x8x128xf32, #tpu.memory_space<vmem>>, vector<1x8x128xf32>
    %588 = vector.shape_cast %587 : vector<1x8x128xf32> to vector<8x128xf32>
    %589 = vector.shape_cast %577 : vector<8x128xf32> to vector<1x8x128xf32>
    tpu.vector_store %arg6[%c3, %c0_118, %c0_119], %589 {strides = array<i32>} : memref<4x8x128xf32, #tpu.memory_space<vmem>>, vector<1x8x128xf32>,
    return
  }
  func.func @transform_0(%arg0: i32) -> i32 {
    %c0_i32 = arith.constant 0 : i32
    %c0_i32_0 = arith.constant 0 : i32
    return %c0_i32 : i32
  }
  func.func @transform_1(%arg0: i32) -> (i32, i32) {
    %c0_i32 = arith.constant 0 : i32
    %c0_i32_0 = arith.constant 0 : i32
    %c0_i32_1 = arith.constant 0 : i32
    return %c0_i32, %c0_i32_0 : i32, i32
  }
  func.func @transform_2(%arg0: i32) -> (i32, i32) {
    %c0_i32 = arith.constant 0 : i32
    %c0_i32_0 = arith.constant 0 : i32
    %c0_i32_1 = arith.constant 0 : i32
    return %c0_i32, %c0_i32_0 : i32, i32
  }
  func.func @transform_3(%arg0: i32) -> (i32, i32, i32) {
    %c0_i32 = arith.constant 0 : i32
    %c0_i32_0 = arith.constant 0 : i32
    %c0_i32_1 = arith.constant 0 : i32
    %c0_i32_2 = arith.constant 0 : i32
    return %c0_i32, %c0_i32_0, %c0_i32_1 : i32, i32, i32
  }
  func.func @transform_4(%arg0: i32) -> (i32, i32, i32) {
    %c0_i32 = arith.constant 0 : i32
    %c0_i32_0 = arith.constant 0 : i32
    %c0_i32_1 = arith.constant 0 : i32
    %c0_i32_2 = arith.constant 0 : i32
    return %c0_i32, %c0_i32_0, %c0_i32_1 : i32, i32, i32
  }
  func.func @transform_5(%arg0: i32) -> (i32, i32, i32) {
    %c0_i32 = arith.constant 0 : i32
    %c0_i32_0 = arith.constant 0 : i32
    %c0_i32_1 = arith.constant 0 : i32
    %c0_i32_2 = arith.constant 0 : i32
    return %c0_i32, %c0_i32_0, %c0_i32_1 : i32, i32, i32
  }
}

</mosaic_0001>

<bundles_post_ra>
// kernel: mainnet_forward.1
= control target key start
LH: loop header
LB: loop body
LE: loop exit
PB: predicated region body
PF: predicated region fallthrough
CT: control target
= control target key end

     0   :  { %10 = vsyncpa [#allocation3], 0  ;;  %s1128_s0 = inlined_call_operand.vmem [shape: f32[4], index: 0, kind: input, shape index: {}]   ;;  %s1129_s1 = inlined_call_operand.vmem [shape: f32[8,128], index: 1, kind: input, shape index: {}]   ;;  %s1130_s2 = inlined_call_operand.vmem [shape: f32[16,128], index: 2, kind: input, shape index: {}]   ;;  %s1131_s3 = inlined_call_operand.vmem [shape: f32[2,16,128], index: 3, kind: input, shape index: {}]   ;;  %s1132_s4 = inlined_call_operand.vmem [shape: f32[2,16,128], index: 4, kind: input, shape index: {}]   ;;  %s1133_s5 = inlined_call_operand.vmem [shape: f32[4,8,128], index: 5, kind: output, shape index: {}]  }
   0x1   :  { %s17_s20 = sshll.u32 %s1128_s0, 4  ;;  %s18_s20 = int_to_ptr.vmem [resolvable:$true] %s17_s20 }
   0x2   :  { %s731_s21 = scalar_lea.vmem %s18_s20, 16  ;;  %p736_p1 = scmp.lt.s32.totalorder %s18_s20, %s18_s20 }
   0x3   :  { %p732_p0 = scmp.ne.s32.totalorder %s18_s20, %s731_s21  ;;  %p737_p2 = scmp.lt.s32.totalorder %s731_s21, %s731_s21 }
   0x5   :  { %p738_p3 = por %p737_p2, %p736_p1 }
   0x7   :  { %p739_p4 = pnand %p738_p3, %p732_p0 }
   0x9   :  { %742 = shalt.err (!%p739_p4)
}
   0xa   :  { %s745_s22 = smov [#allocation2]  }
   0xb   :  { %20 = dma.vmem_to_smem %s18_s20, 16, %s745_s22, [#allocation3]  }
   0xc   :  { %743 = dma.done.wait [#allocation3], 16  }
   0xd   :  { %744 = vsyncadd [#allocation3], 4294967280 }
   0xe   :  { %32 = sfence }
   0xf   :  { %v784_v0 = vld [vmem:[%s1129_s1] sm:$0xff]  ;;  %vm58_vm0 = vcmask 1040384   ;;  %s746_s0 = smov 112   ;;  %s747_s25 = smov 16   ;;  %vm107_vm1 = vcmask 1046528   ;;  %v33_v5 = vlaneseq  ;;  %v39_v15 = vld [vmem:[%s1130_s2 + $0x8] sm:$0xff] }
  0x10   :  { %75 = vrot.lane.b32.xlu1 %v784_v0, %s746_s0  ;;  %46 = vrot.lane.b32.xlu0 %v784_v0, %s747_s25  ;;  %v56_v1 = vrot.slane %v784_v0, 7  ;;  %v105_v2 = vrot.slane %v784_v0, 1  ;;  %v38_v9 = vld [vmem:[%s1130_s2] sm:$0xff]  ;;  %s163_s11 = sld [smem:[#allocation2]] }
  0x11   :  { %v41_v6 = vshrl.u32 %v33_v5, 7  ;;  %v805_v10 = vand.u32 127, %v33_v5 }
  0x12   :  { %v59_v3 = vsel %vm58_vm0, 0.0, %v56_v1  ;;  %v108_v4 = vsel %vm107_vm1, %v105_v2, 0.0 }
  0x13   :  { %v798_v7 = vsub.s32 6, %v41_v6  ;;  %v800_v8 = vsub.s32 5, %v41_v6  ;;  %v807_v11 = vsub.s32 4, %v41_v6  ;;  %v809_v12 = vsub.s32 7, %v41_v6 }
  0x14   :  { %90 = vrot.lane.b32.xlu1 %v59_v3, %s746_s0  ;;  %66 = vrot.lane.b32.xlu0 %v59_v3, %s747_s25  ;;  %vm35_vm2 = vcmp.lt.s32.totalorder %v805_v10, 112  ;;  %vm36_vm3 = vcmp.ge.s32.totalorder %v805_v10, 16  ;;  %v821_v19 = vsub.s32 0, %v41_v6  ;;  %v825_v24 = vsub.s32 2, %v41_v6 }
  0x15   :  { %v87_v13 = vrot.slane %v38_v9, %v798_v7  ;;  %v43_v14 = vrot.slane %v38_v9, %v800_v8  ;;  %v81_v16 = vrot.slane %v38_v9, %v807_v11  ;;  %v52_v17 = vrot.slane %v38_v9, %v809_v12 }
  0x16   :  { %v63_v18 = vrot.slane %v39_v15, %v800_v8  ;;  %v827_v25 = vsub.s32 1, %v41_v6  ;;  %v96_v28 = vrot.slane %v39_v15, %v807_v11  ;;  %v102_v29 = vrot.slane %v39_v15, %v798_v7 }
  0x17   :  { %v88_v21 = vmul.f32 %v87_v13, %v784_v0  ;;  %v44_v23 = vmul.f32 %v43_v14, %v784_v0  ;;  %v72_v33 = vrot.slane %v39_v15, %v809_v12  ;;  %v836_v34 = vsub.s32 3, %v41_v6 }
  0x18   :  { %136 = vrot.lane.b32.xlu1 %v108_v4, %s746_s0  ;;  %115 = vrot.lane.b32.xlu0 %v108_v4, %s747_s25  ;;  %v64_v32 = vmul.f32 %v63_v18, %v59_v3  ;;  %v142_v35 = vrot.slane %v38_v9, %v821_v19  ;;  %v148_v40 = vrot.slane %v38_v9, %v825_v24 }
  0x19   :  { %v112_v41 = vrot.slane %v38_v9, %v827_v25  ;;  %v103_v43 = vmul.f32 %v102_v29, %v59_v3  ;;  %v127_v45 = vrot.slane %v39_v15, %v827_v25  ;;  %v121_v49 = vrot.slane %v38_v9, %v836_v34  ;;  %v891_v29 = vld [vmem:[%s1131_s3 + $0x8] sm:$0xff] }
  0x1a   :  { %v154_v50 = vrot.slane %v39_v15, %v821_v19  ;;  %v160_v51 = vrot.slane %v39_v15, %v825_v24  ;;  %v149_v55 = vmul.f32 %v148_v40, %v108_v4  ;;  %v133_v58 = vrot.slane %v39_v15, %v836_v34 }
  0x1b   :  { %v113_v57 = vmul.f32 %v112_v41, %v108_v4  ;;  %v128_v61 = vmul.f32 %v127_v45, %v784_v0 }
  0x1c   :  { %v161_v4 = vmul.f32 %v160_v51, %v784_v0 }
  0x82   :  { %v76_v20 = vpop.permute.xlu1 %75  ;;  %v47_v22 = vpop.permute.xlu0 %46 }
  0x83   :  { %v77_v26 = vsel %vm35_vm2, %v76_v20, 0.0  ;;  %v48_v27 = vsel %vm36_vm3, %v47_v22, 0.0 }
  0x84   :  { %v82_v30 = vmul.f32 %v81_v16, %v77_v26  ;;  %v53_v31 = vmul.f32 %v52_v17, %v48_v27  ;;  %v155_v3 = vmul.f32 %v154_v50, %v77_v26  ;;  %v134_v14 = vmul.f32 %v133_v58, %v48_v27  ;;  %v164_v27 = vld [vmem:[%s1131_s3] sm:$0xff] }
  0x86   :  { %v89_v36 = vadd.f32 %v88_v21, %v82_v30  ;;  %v54_v37 = vadd.f32 %v53_v31, %v44_v23  ;;  %v91_v38 = vpop.permute.xlu1 %90  ;;  %v67_v39 = vpop.permute.xlu0 %66  ;;  %v168_v30 = vsub.f32 0.0, %v784_v0  ;;  %v181_v31 = vrot.slane %v164_v27, %v809_v12 }
  0x87   :  { %v92_v42 = vsel %vm35_vm2, %v91_v38, 0.0  ;;  %v68_v44 = vsel %vm36_vm3, %v67_v39, 0.0 }
  0x88   :  { %v97_v46 = vmul.f32 %v96_v28, %v92_v42  ;;  %v65_v47 = vadd.f32 %v64_v32, %v54_v37  ;;  %v73_v48 = vmul.f32 %v72_v33, %v68_v44  ;;  %v172_v28 = vrot.slane %v164_v27, %v800_v8 }
  0x89   :  { %v191_v33 = vrot.slane %v891_v29, %v800_v8  ;;  %v200_v37 = vrot.slane %v891_v29, %v809_v12  ;;  %v209_v44 = vrot.slane %v164_v27, %v807_v11 }
  0x8a   :  { %v98_v52 = vadd.f32 %v97_v46, %v89_v36  ;;  %v849_v53 = vadd.f32 %v73_v48, %v65_v47  ;;  %v137_v54 = vpop.permute.xlu1 %136  ;;  %v116_v56 = vpop.permute.xlu0 %115 }
  0x8b   :  { %v138_v59 = vsel %vm35_vm2, %v137_v54, 0.0  ;;  %v117_v60 = vsel %vm36_vm3, %v116_v56, 0.0  ;;  %v228_v54 = vrot.slane %v891_v29, %v807_v11  ;;  %v234_v56 = vrot.slane %v891_v29, %v798_v7 }
  0x8c   :  { %v857_v62 = vadd.f32 %v103_v43, %v98_v52  ;;  %v143_v63 = vmul.f32 %v142_v35, %v138_v59  ;;  %v122_v1 = vmul.f32 %v121_v49, %v117_v60  ;;  %175 = vrot.lane.b32.xlu0 %v849_v53, %s746_s0  ;;  %v185_v2 = vrot.slane %v849_v53, 1 }
  0x8d   :  { %v173_v32 = vmul.f32 %v172_v28, %v849_v53  ;;  %v215_v49 = vrot.slane %v164_v27, %v798_v7  ;;  %v244_v59 = vrot.slane %v164_v27, %v827_v25 }
  0x8e   :  { %v150_v5 = vadd.f32 %v149_v55, %v143_v63  ;;  %v123_v6 = vadd.f32 %v122_v1, %v113_v57  ;;  %v187_v9 = vsel %vm107_vm1, %v185_v2, 0.0  ;;  %v219_v13 = vrot.slane %v857_v62, 1 }
  0x8f   :  { %194 = vrot.lane.b32.xlu1 %v187_v9, %s746_s0  ;;  %v174_v38 = vadd.f32 %v173_v32, %v168_v30  ;;  %v192_v41 = vmul.f32 %v191_v33, %v187_v9  ;;  %v216_v58 = vmul.f32 %v215_v49, %v857_v62  ;;  %v259_v9 = vrot.slane %v891_v29, %v827_v25 }
  0x90   :  { %v156_v15 = vadd.f32 %v155_v3, %v150_v5  ;;  %v129_v16 = vadd.f32 %v128_v61, %v123_v6  ;;  %203 = vrot.lane.b32.xlu0 %v857_v62, %s747_s25  ;;  %v221_v17 = vsel %vm107_vm1, %v219_v13, 0.0  ;;  %v253_v3 = vrot.slane %v164_v27, %v836_v34 }
  0x91   :  { %v235_v1 = vmul.f32 %v234_v56, %v221_v17  ;;  %v287_v32 = vrot.slane %v164_v27, %v825_v24 }
  0x92   :  { %v869_v18 = vadd.f32 %v161_v4, %v156_v15  ;;  %v871_v20 = vadd.f32 %v134_v14, %v129_v16  ;;  %v268_v16 = vrot.slane %v891_v29, %v836_v34 }
  0x93   :  { %222 = vrot.lane.b32.xlu1 %v221_v17, %s747_s25 }
  0x94   :  { %v238_v21 = vrot.slane %v871_v20, 7  ;;  %v272_v23 = vrot.slane %v869_v18, 7  ;;  %v260_v28 = vmul.f32 %v259_v9, %v871_v20 }
  0x96   :  { %v240_v22 = vsel %vm58_vm0, 0.0, %v238_v21  ;;  %v274_v26 = vsel %vm58_vm0, 0.0, %v272_v23 }
  0x97   :  { %247 = vrot.lane.b32.xlu0 %v240_v22, %s746_s0  ;;  %262 = vrot.lane.b32.xlu1 %v871_v20, %s746_s0  ;;  %v245_v5 = vmul.f32 %v244_v59, %v240_v22 }
  0x9b   :  { %275 = vrot.lane.b32.xlu0 %v274_v26, %s747_s25  ;;  %290 = vrot.lane.b32.xlu1 %v869_v18, %s747_s25 }
  0xfe   :  { %v176_v35 = vpop.permute.xlu0 %175 }
  0xff   :  { %v177_v36 = vsel %vm35_vm2, %v176_v35, 0.0 }
 0x100   :  { %v182_v39 = vmul.f32 %v181_v31, %v177_v36  ;;  %v281_v31 = vrot.slane %v164_v27, %v821_v19 }
 0x101   :  { %v195_v40 = vpop.permute.xlu1 %194 }
 0x102   :  { %v183_v42 = vadd.f32 %v182_v39, %v174_v38  ;;  %v196_v43 = vsel %vm35_vm2, %v195_v40, 0.0  ;;  %v204_v45 = vpop.permute.xlu0 %203  ;;  %v296_v39 = vrot.slane %v891_v29, %v821_v19 }
 0x103   :  { %v201_v46 = vmul.f32 %v200_v37, %v196_v43  ;;  %v205_v47 = vsel %vm36_vm3, %v204_v45, 0.0  ;;  %v302_v43 = vrot.slane %v891_v29, %v825_v24 }
 0x104   :  { %v193_v48 = vadd.f32 %v192_v41, %v183_v42  ;;  %v210_v52 = vmul.f32 %v209_v44, %v205_v47  ;;  %v288_v41 = vmul.f32 %v287_v32, %v274_v26 }
 0x105   :  { %v223_v50 = vpop.permute.xlu1 %222  ;;  %v303_v27 = vmul.f32 %v302_v43, %v869_v18 }
 0x106   :  { %v202_v51 = vadd.f32 %v201_v46, %v193_v48  ;;  %v224_v55 = vsel %vm36_vm3, %v223_v50, 0.0  ;;  %v166_v50 = vld [vmem:[%s1132_s4] sm:$0xff] }
 0x107   :  { %v229_v61 = vmul.f32 %v228_v54, %v224_v55  ;;  %v167_v54 = vld [vmem:[%s1132_s4 + $0x8] sm:$0xff] }
 0x108   :  { %v211_v57 = vadd.f32 %v210_v52, %v202_v51  ;;  %v308_v51 = vrot.slane %v166_v50, %v800_v8  ;;  %v317_v52 = vrot.slane %v166_v50, %v809_v12  ;;  %v327_v56 = vrot.slane %v167_v54, %v800_v8 }
 0x109   :  { %v248_v63 = vpop.permute.xlu0 %247  ;;  %v263_v13 = vpop.permute.xlu1 %262 }
 0x10a   :  { %v217_v60 = vadd.f32 %v216_v58, %v211_v57  ;;  %v249_v4 = vsel %vm35_vm2, %v248_v63, 0.0  ;;  %v264_v17 = vsel %vm35_vm2, %v263_v13, 0.0  ;;  %v336_v58 = vrot.slane %v167_v54, %v809_v12 }
 0x10b   :  { %v254_v15 = vmul.f32 %v253_v3, %v249_v4  ;;  %v269_v35 = vmul.f32 %v268_v16, %v264_v17  ;;  %v351_v63 = vrot.slane %v166_v50, %v798_v7  ;;  %v360_v13 = vrot.slane %v167_v54, %v807_v11 }
 0x10c   :  { %v230_v2 = vadd.f32 %v229_v61, %v217_v60  ;;  %v345_v61 = vrot.slane %v166_v50, %v807_v11  ;;  %v384_v17 = vrot.slane %v166_v50, %v836_v34 }
 0x10d   :  { %v276_v21 = vpop.permute.xlu0 %275  ;;  %v291_v36 = vpop.permute.xlu1 %290 }
 0x10e   :  { %v236_v6 = vadd.f32 %v235_v1, %v230_v2  ;;  %v277_v22 = vsel %vm36_vm3, %v276_v21, 0.0  ;;  %v292_v40 = vsel %vm36_vm3, %v291_v36, 0.0 }
 0x10f   :  { %v282_v38 = vmul.f32 %v281_v31, %v277_v22  ;;  %v297_v45 = vmul.f32 %v296_v39, %v292_v40  ;;  %v405_v39 = vrot.slane %v166_v50, %v821_v19  ;;  %v411_v40 = vrot.slane %v166_v50, %v825_v24 }
 0x110   :  { %v246_v14 = vadd.f32 %v245_v5, %v236_v6 }
 0x112   :  { %v255_v23 = vadd.f32 %v254_v15, %v246_v14  ;;  %v375_v14 = vrot.slane %v166_v50, %v827_v25 }
 0x114   :  { %v261_v33 = vadd.f32 %v260_v28, %v255_v23  ;;  %v426_v23 = vstv %s163_s11  ;;  %v366_v28 = vrot.slane %v167_v54, %v798_v7 }
 0x116   :  { %v270_v37 = vadd.f32 %v269_v35, %v261_v33  ;;  %v390_v35 = vrot.slane %v167_v54, %v827_v25 }
 0x118   :  { %v283_v42 = vadd.f32 %v282_v38, %v270_v37 }
 0x11a   :  { %v289_v44 = vadd.f32 %v288_v41, %v283_v42  ;;  %v396_v41 = vrot.slane %v167_v54, %v836_v34 }
 0x11c   :  { %v298_v46 = vadd.f32 %v297_v45, %v289_v44  ;;  %v417_v45 = vrot.slane %v167_v54, %v821_v19 }
 0x11e   :  { %v939_v47 = vadd.f32 %v303_v27, %v298_v46 }
 0x120   :  { %311 = vrot.lane.b32.xlu0 %v939_v47, %s747_s25  ;;  %v321_v48 = vrot.slane %v939_v47, 7  ;;  %v369_v26 = vrot.slane %v939_v47, 1  ;;  %v309_v59 = vmul.f32 %v308_v51, %v939_v47  ;;  %v352_v21 = vmul.f32 %v351_v63, %v939_v47 }
 0x122   :  { %v323_v49 = vsel %vm58_vm0, 0.0, %v321_v48  ;;  %v371_v29 = vsel %vm107_vm1, %v369_v26, 0.0  ;;  %v391_v26 = vmul.f32 %v390_v35, %v939_v47 }
 0x123   :  { %330 = vrot.lane.b32.xlu1 %v323_v49, %s747_s25  ;;  %v328_v3 = vmul.f32 %v327_v56, %v323_v49  ;;  %v376_v43 = vmul.f32 %v375_v14, %v371_v29  ;;  %v367_v46 = vmul.f32 %v366_v28, %v323_v49  ;;  %v412_v56 = vmul.f32 %v411_v40, %v371_v29 }
 0x124   :  { %339 = vrot.lane.b32.xlu0 %v939_v47, %s746_s0 }
 0x127   :  { %354 = vrot.lane.b32.xlu1 %v323_v49, %s746_s0 }
 0x128   :  { %378 = vrot.lane.b32.xlu0 %v371_v29, %s747_s25 }
 0x12b   :  { %399 = vrot.lane.b32.xlu1 %v371_v29, %s746_s0 }
 0x192   :  { %v312_v55 = vpop.permute.xlu0 %311 }
 0x193   :  { %v313_v57 = vsel %vm36_vm3, %v312_v55, 0.0 }
 0x194   :  { %v318_v60 = vmul.f32 %v317_v52, %v313_v57 }
 0x195   :  { %v331_v1 = vpop.permute.xlu1 %330 }
 0x196   :  { %v319_v2 = vadd.f32 %v318_v60, %v309_v59  ;;  %v332_v4 = vsel %vm36_vm3, %v331_v1, 0.0  ;;  %v340_v5 = vpop.permute.xlu0 %339  ;;  %v397_v60 = vmul.f32 %v396_v41, %v313_v57 }
 0x197   :  { %v337_v6 = vmul.f32 %v336_v58, %v332_v4  ;;  %v341_v9 = vsel %vm35_vm2, %v340_v5, 0.0  ;;  %v423_v58 = vrot.slane %v167_v54, %v825_v24 }
 0x198   :  { %v329_v15 = vadd.f32 %v328_v3, %v319_v2  ;;  %v346_v16 = vmul.f32 %v345_v61, %v341_v9  ;;  %v418_v63 = vmul.f32 %v417_v45, %v341_v9 }
 0x199   :  { %v355_v31 = vpop.permute.xlu1 %354 }
 0x19a   :  { %v338_v22 = vadd.f32 %v337_v6, %v329_v15  ;;  %v353_v32 = vadd.f32 %v352_v21, %v346_v16  ;;  %v356_v33 = vsel %vm35_vm2, %v355_v31, 0.0  ;;  %v379_v36 = vpop.permute.xlu0 %378 }
 0x19b   :  { %v361_v37 = vmul.f32 %v360_v13, %v356_v33  ;;  %v380_v38 = vsel %vm36_vm3, %v379_v36, 0.0 }
 0x19c   :  { %v427_v42 = vmul.f32 %v426_v23, %v338_v22  ;;  %v385_v44 = vmul.f32 %v384_v17, %v380_v38  ;;  %v722_v17 = vld [vmem:[%s1131_s3 + $0x18] sm:$0xff] }
 0x19d   :  { %v362_v27 = vadd.f32 %v361_v37, %v353_v32  ;;  %v400_v48 = vpop.permute.xlu1 %399  ;;  %v464_v31 = vrot.slane %v722_v17, %v800_v8  ;;  %v473_v33 = vrot.slane %v722_v17, %v809_v12 }
 0x19e   :  { %v386_v51 = vadd.f32 %v385_v44, %v376_v43  ;;  %v401_v52 = vsel %vm35_vm2, %v400_v48, 0.0  ;;  %v990_v55 = vsub.f32 %v849_v53, %v427_v42  ;;  %v424_v53 = vmul.f32 %v423_v58, %v939_v47 }
 0x19f   :  { %v368_v50 = vadd.f32 %v367_v46, %v362_v27  ;;  %v406_v59 = vmul.f32 %v405_v39, %v401_v52 }
 0x1a0   :  { %v392_v61 = vadd.f32 %v391_v26, %v386_v51  ;;  %448 = vrot.lane.b32.xlu0 %v990_v55, %s746_s0  ;;  %v458_v49 = vrot.slane %v990_v55, 1  ;;  %v507_v51 = vrot.slane %v722_v17, %v798_v7 }
 0x1a1   :  { %v429_v1 = vmul.f32 %v426_v23, %v368_v50  ;;  %v413_v2 = vadd.f32 %v412_v56, %v406_v59 }
 0x1a2   :  { %v398_v3 = vadd.f32 %v397_v60, %v392_v61  ;;  %v460_v4 = vsel %vm107_vm1, %v458_v49, 0.0 }
 0x1a3   :  { %v419_v5 = vadd.f32 %v418_v63, %v413_v2  ;;  %467 = vrot.lane.b32.xlu1 %v460_v4, %s746_s0  ;;  %v1000_v29 = vsub.f32 %v857_v62, %v429_v1  ;;  %v465_v39 = vmul.f32 %v464_v31, %v460_v4  ;;  %v532_v4 = vrot.slane %v722_v17, %v827_v25 }
 0x1a4   :  { %v431_v54 = vmul.f32 %v426_v23, %v398_v3 }
 0x1a5   :  { %v425_v57 = vadd.f32 %v424_v53, %v419_v5  ;;  %476 = vrot.lane.b32.xlu0 %v1000_v29, %s747_s25  ;;  %v492_v6 = vrot.slane %v1000_v29, 1 }
 0x1a6   :  { %v1006_v9 = vsub.f32 %v871_v20, %v431_v54 }
 0x1a7   :  { %v433_v13 = vmul.f32 %v426_v23, %v425_v57  ;;  %v494_v14 = vsel %vm107_vm1, %v492_v6, 0.0  ;;  %v541_v57 = vrot.slane %v722_v17, %v836_v34 }
 0x1a8   :  { %495 = vrot.lane.b32.xlu1 %v494_v14, %s747_s25  ;;  %v511_v47 = vrot.slane %v1006_v9, 7  ;;  %v508_v61 = vmul.f32 %v507_v51, %v494_v14 }
 0x1a9   :  { %v1012_v62 = vsub.f32 %v869_v18, %v433_v13  ;;  %v721_v18 = vld [vmem:[%s1131_s3 + $0x10] sm:$0xff] }
 0x1aa   :  { %v513_v15 = vsel %vm58_vm0, 0.0, %v511_v47  ;;  %v445_v21 = vrot.slane %v721_v18, %v800_v8  ;;  %v454_v23 = vrot.slane %v721_v18, %v809_v12  ;;  %v482_v38 = vrot.slane %v721_v18, %v807_v11 }
 0x1ab   :  { %520 = vrot.lane.b32.xlu0 %v513_v15, %s746_s0  ;;  %v545_v16 = vrot.slane %v1012_v62, 7  ;;  %v488_v27 = vrot.slane %v721_v18, %v798_v7  ;;  %v517_v56 = vrot.slane %v721_v18, %v827_v25  ;;  %v526_v63 = vrot.slane %v721_v18, %v836_v34 }
 0x1ac   :  { %535 = vrot.lane.b32.xlu1 %v1006_v9, %s746_s0  ;;  %v446_v28 = vmul.f32 %v445_v21, %v990_v55  ;;  %v533_v47 = vmul.f32 %v532_v4, %v1006_v9  ;;  %v560_v21 = vrot.slane %v721_v18, %v825_v24 }
 0x1ad   :  { %v547_v20 = vsel %vm58_vm0, 0.0, %v545_v16  ;;  %v489_v50 = vmul.f32 %v488_v27, %v1000_v29  ;;  %v518_v2 = vmul.f32 %v517_v56, %v513_v15  ;;  %v554_v16 = vrot.slane %v721_v18, %v821_v19 }
 0x1ae   :  { %v447_v35 = vadd.f32 %v446_v28, %v168_v30  ;;  %v501_v30 = vrot.slane %v722_v17, %v807_v11 }
 0x1af   :  { %548 = vrot.lane.b32.xlu0 %v547_v20, %s747_s25 }
 0x1b0   :  { %563 = vrot.lane.b32.xlu1 %v1012_v62, %s747_s25 }
 0x212   :  { %v449_v22 = vpop.permute.xlu0 %448 }
 0x213   :  { %v450_v32 = vsel %vm35_vm2, %v449_v22, 0.0 }
 0x214   :  { %v455_v36 = vmul.f32 %v454_v23, %v450_v32 }
 0x215   :  { %v468_v37 = vpop.permute.xlu1 %467 }
 0x216   :  { %v456_v40 = vadd.f32 %v455_v36, %v447_v35  ;;  %v469_v41 = vsel %vm35_vm2, %v468_v37, 0.0  ;;  %v561_v36 = vmul.f32 %v560_v21, %v547_v20 }
 0x217   :  { %v474_v42 = vmul.f32 %v473_v33, %v469_v41  ;;  %v477_v43 = vpop.permute.xlu0 %476  ;;  %v569_v33 = vrot.slane %v722_v17, %v821_v19 }
 0x218   :  { %v466_v44 = vadd.f32 %v465_v39, %v456_v40  ;;  %v478_v45 = vsel %vm36_vm3, %v477_v43, 0.0 }
 0x219   :  { %v483_v46 = vmul.f32 %v482_v38, %v478_v45  ;;  %v575_v38 = vrot.slane %v722_v17, %v825_v24  ;;  %v723_v17 = vld [vmem:[%s1132_s4 + $0x10] sm:$0xff] }
 0x21a   :  { %v475_v0 = vadd.f32 %v474_v42, %v466_v44  ;;  %v496_v48 = vpop.permute.xlu1 %495  ;;  %v581_v27 = vrot.slane %v723_v17, %v800_v8  ;;  %v684_v51 = vrot.slane %v723_v17, %v825_v24 }
 0x21b   :  { %v497_v26 = vsel %vm36_vm3, %v496_v48, 0.0  ;;  %v576_v41 = vmul.f32 %v575_v38, %v1012_v62 }
 0x21c   :  { %v484_v52 = vadd.f32 %v483_v46, %v475_v0  ;;  %v502_v59 = vmul.f32 %v501_v30, %v497_v26  ;;  %v590_v46 = vrot.slane %v723_v17, %v809_v12  ;;  %v724_v0 = vld [vmem:[%s1132_s4 + $0x18] sm:$0xff]  ;;  %v624_v30 = vrot.slane %v723_v17, %v798_v7  ;;  %s1096_s4 = sld [smem:[#allocation2 + $0x2]] }
 0x21d   :  { %v521_v60 = vpop.permute.xlu0 %520 }
 0x21e   :  { %v490_v58 = vadd.f32 %v489_v50, %v484_v52  ;;  %v522_v1 = vsel %vm35_vm2, %v521_v60, 0.0  ;;  %v536_v53 = vpop.permute.xlu1 %535  ;;  %v600_v52 = vrot.slane %v724_v0, %v800_v8  ;;  %v618_v50 = vrot.slane %v723_v17, %v807_v11 }
 0x21f   :  { %v527_v54 = vmul.f32 %v526_v63, %v522_v1  ;;  %v537_v13 = vsel %vm35_vm2, %v536_v53, 0.0  ;;  %v657_v63 = vrot.slane %v723_v17, %v836_v34  ;;  %v690_v1 = vrot.slane %v724_v0, %v821_v19 }
 0x220   :  { %v503_v49 = vadd.f32 %v502_v59, %v490_v58  ;;  %v542_v28 = vmul.f32 %v541_v57, %v537_v13  ;;  %v678_v58 = vrot.slane %v723_v17, %v821_v19  ;;  %v648_v59 = vrot.slane %v723_v17, %v827_v25 }
 0x221   :  { %v549_v6 = vpop.permute.xlu0 %548  ;;  %v669_v8 = vrot.slane %v724_v0, %v836_v34 }
 0x222   :  { %v509_v3 = vadd.f32 %v508_v61, %v503_v49  ;;  %v550_v15 = vsel %vm36_vm3, %v549_v6, 0.0  ;;  %v564_v31 = vpop.permute.xlu1 %563  ;;  %v633_v6 = vrot.slane %v724_v0, %v807_v11 }
 0x223   :  { %v555_v32 = vmul.f32 %v554_v16, %v550_v15  ;;  %v565_v35 = vsel %vm36_vm3, %v564_v31, 0.0 }
 0x224   :  { %v519_v5 = vadd.f32 %v518_v2, %v509_v3  ;;  %v570_v40 = vmul.f32 %v569_v33, %v565_v35  ;;  %v696_v2 = vrot.slane %v724_v0, %v825_v24  ;;  %v663_v3 = vrot.slane %v724_v0, %v827_v25 }
 0x226   :  { %v528_v14 = vadd.f32 %v527_v54, %v519_v5  ;;  %v609_v54 = vrot.slane %v724_v0, %v809_v12  ;;  %v639_v12 = vrot.slane %v724_v0, %v798_v7 }
 0x228   :  { %v534_v23 = vadd.f32 %v533_v47, %v528_v14 }
 0x22a   :  { %v543_v22 = vadd.f32 %v542_v28, %v534_v23 }
 0x22c   :  { %v556_v37 = vadd.f32 %v555_v32, %v543_v22 }
 0x22e   :  { %v562_v39 = vadd.f32 %v561_v36, %v556_v37 }
 0x230   :  { %v571_v42 = vadd.f32 %v570_v40, %v562_v39 }
 0x232   :  { %v577_v18 = vadd.f32 %v576_v41, %v571_v42  ;;  %v699_v42 = vstv %s1096_s4 }
 0x234   :  { %612 = vrot.lane.b32.xlu1 %v577_v18, %s746_s0  ;;  %584 = vrot.lane.b32.xlu0 %v577_v18, %s747_s25  ;;  %v642_v43 = vrot.slane %v577_v18, 1  ;;  %v594_v45 = vrot.slane %v577_v18, 7  ;;  %v582_v61 = vmul.f32 %v581_v27, %v577_v18  ;;  %v625_v15 = vmul.f32 %v624_v30, %v577_v18 }
 0x235   :  { %v697_v21 = vmul.f32 %v696_v2, %v577_v18  ;;  %v664_v11 = vmul.f32 %v663_v3, %v577_v18 }
 0x236   :  { %v644_v44 = vsel %vm107_vm1, %v642_v43, 0.0  ;;  %v596_v20 = vsel %vm58_vm0, 0.0, %v594_v45 }
 0x237   :  { %v601_v57 = vmul.f32 %v600_v52, %v596_v20  ;;  %v685_v14 = vmul.f32 %v684_v51, %v644_v44  ;;  %v649_v24 = vmul.f32 %v648_v59, %v644_v44  ;;  %v640_v7 = vmul.f32 %v639_v12, %v596_v20 }
 0x238   :  { %672 = vrot.lane.b32.xlu1 %v644_v44, %s746_s0  ;;  %651 = vrot.lane.b32.xlu0 %v644_v44, %s747_s25 }
 0x23c   :  { %603 = vrot.lane.b32.xlu1 %v596_v20, %s747_s25  ;;  %627 = vrot.lane.b32.xlu0 %v596_v20, %s746_s0 }
 0x2a6   :  { %v613_v48 = vpop.permute.xlu1 %612  ;;  %v585_v26 = vpop.permute.xlu0 %584 }
 0x2a7   :  { %v586_v56 = vsel %vm36_vm3, %v585_v26, 0.0  ;;  %v614_v60 = vsel %vm35_vm2, %v613_v48, 0.0 }
 0x2a8   :  { %v591_v49 = vmul.f32 %v590_v46, %v586_v56  ;;  %v619_v13 = vmul.f32 %v618_v50, %v614_v60  ;;  %v691_v23 = vmul.f32 %v690_v1, %v614_v60  ;;  %v670_v35 = vmul.f32 %v669_v8, %v586_v56 }
 0x2aa   :  { %v592_v4 = vadd.f32 %v591_v49, %v582_v61  ;;  %v673_v53 = vpop.permute.xlu1 %672  ;;  %v652_v5 = vpop.permute.xlu0 %651  ;;  %v626_v33 = vadd.f32 %v625_v15, %v619_v13 }
 0x2ab   :  { %v674_v19 = vsel %vm35_vm2, %v673_v53, 0.0  ;;  %v653_v34 = vsel %vm36_vm3, %v652_v5, 0.0 }
 0x2ac   :  { %v679_v47 = vmul.f32 %v678_v58, %v674_v19  ;;  %v658_v16 = vmul.f32 %v657_v63, %v653_v34  ;;  %v602_v25 = vadd.f32 %v601_v57, %v592_v4 }
 0x2ae   :  { %v686_v28 = vadd.f32 %v685_v14, %v679_v47  ;;  %v659_v31 = vadd.f32 %v658_v16, %v649_v24  ;;  %v604_v22 = vpop.permute.xlu1 %603  ;;  %v628_v32 = vpop.permute.xlu0 %627 }
 0x2af   :  { %v605_v36 = vsel %vm36_vm3, %v604_v22, 0.0  ;;  %v629_v37 = vsel %vm35_vm2, %v628_v32, 0.0 }
 0x2b0   :  { %v692_v38 = vadd.f32 %v691_v23, %v686_v28  ;;  %v665_v39 = vadd.f32 %v664_v11, %v659_v31  ;;  %v610_v40 = vmul.f32 %v609_v54, %v605_v36  ;;  %v634_v41 = vmul.f32 %v633_v6, %v629_v37 }
 0x2b2   :  { %v698_v43 = vadd.f32 %v697_v21, %v692_v38  ;;  %v671_v44 = vadd.f32 %v670_v35, %v665_v39  ;;  %v611_v18 = vadd.f32 %v610_v40, %v602_v25  ;;  %v635_v45 = vadd.f32 %v634_v41, %v626_v33 }
 0x2b4   :  { %v706_v17 = vmul.f32 %v699_v42, %v698_v43  ;;  %v704_v27 = vmul.f32 %v699_v42, %v671_v44  ;;  %v700_v46 = vmul.f32 %v699_v42, %v611_v18  ;;  %v641_v0 = vadd.f32 %v640_v7, %v635_v45 }
 0x2b6   :  { %v707_v30 = vsub.f32 %v1012_v62, %v706_v17  ;;  %v705_v48 = vsub.f32 %v1006_v9, %v704_v27  ;;  %v701_v10 = vsub.f32 %v990_v55, %v700_v46  ;;  %v702_v26 = vmul.f32 %v699_v42, %v641_v0 }
 0x2b8   :  { %727 = vst [vmem:[%s1133_s5 + $0x18] sm:$0xff] %v707_v30  ;;  %726 = vst [vmem:[%s1133_s5 + $0x10] sm:$0xff] %v705_v48  ;;  %v703_v20 = vsub.f32 %v1000_v29, %v702_v26 }
 0x2b9   :  { %708 = vst [vmem:[%s1133_s5] sm:$0xff] %v701_v10 }
 0x2ba   :  { %725 = vst [vmem:[%s1133_s5 + $0x8] sm:$0xff] %v703_v20 }
 0x2bb   :  { %719 = vsyncpa [#allocation3], 1 }

</bundles_post_ra>
